<compile_context>
chip_gen: v7x
topology: tpu7x:2x2x1
jax: 0.10.0
libtpu: 0.0.40
codegen_flags: <defaults>
</compile_context>

<pallas_src>
import functools

import jax
import jax.numpy as jnp
from jax.experimental import pallas as pl
from jax.experimental.pallas import tpu as pltpu


def _round_up(x, m):
    return ((x + m - 1) // m) * m


def _cdiv(a, b):
    return -(-a // b)


def _physical_vmem_bytes():
    """Per-core physical VMEM; conservative 64 MiB (v7x) if the query fails."""
    try:
        return int(pltpu.get_tpu_info().vmem_capacity_bytes)
    except Exception:  # pragma: no cover - query unavailable on some setups
        return 64 << 20


def _encoder_kernel(x_ref, w1_ref, b1_ref, w2_ref, b2_ref, out_ref):
    # fc1: MXU matmul with f32 accumulation; f32 bias + ReLU epilogue (VPU).
    h = jnp.dot(x_ref[...], w1_ref[...], preferred_element_type=jnp.float32)
    h = jnp.maximum(h + b1_ref[...], 0.0)

    # Fused fc_mu | fc_logvar: one matmul over the concatenated, lane-padded
    # weight block. Operands go back to the MXU compute dtype (bf16 on the
    # fast path); accumulation and bias add stay f32.
    h = h.astype(w2_ref.dtype)
    y = jnp.dot(h, w2_ref[...], preferred_element_type=jnp.float32)
    out_ref[...] = (y + b2_ref[...]).astype(out_ref.dtype)


def prepare_fcnn_encoder_params(w1, b1, wmu, bmu, wlv, blv, *, compute_dtype=None):
    """One-time weight preparation (hoisted out of the per-call path).

    w1:  (input_dim, hidden_dim)    b1:  (hidden_dim,) or (1, hidden_dim)
    wmu: (hidden_dim, latent_dim)   bmu: (latent_dim,) or (1, latent_dim)
    wlv: (hidden_dim, latent_dim)   blv: (latent_dim,) or (1, latent_dim)

    Returns a dict of fused / 128-padded / pre-cast arrays plus static ints.
    Call once per weight update; reuse across fcnn_encoder_apply() calls.
    """
    w1 = jnp.asarray(w1)
    wmu = jnp.asarray(wmu)
    wlv = jnp.asarray(wlv)
    input_dim, hidden_dim = w1.shape
    latent_dim = wmu.shape[1]

    cdt = jnp.dtype(compute_dtype) if compute_dtype is not None else jnp.dtype(jnp.float32)

    padded_in = _round_up(input_dim, 128)
    padded_hid = _round_up(hidden_dim, 128)
    fused_cols = 2 * latent_dim
    padded_out = _round_up(fused_cols, 128)

    # fc1 weight: (padded_in, padded_hid), zero-padded (zero K-cols / N-cols
    # contribute nothing; ReLU(0 + 0) = 0 keeps the padded hidden lanes inert).
    w1p = jnp.pad(w1.astype(cdt),
                  ((0, padded_in - input_dim), (0, padded_hid - hidden_dim)))
    b1p = jnp.pad(jnp.asarray(b1, jnp.float32).reshape(1, -1),
                  ((0, 0), (0, padded_hid - hidden_dim)))

    # Fused mu|logvar weight: (padded_hid, padded_out), lane-dense output.
    w2 = jnp.concatenate([wmu, wlv], axis=1).astype(cdt)
    w2p = jnp.pad(w2, ((0, padded_hid - hidden_dim), (0, padded_out - fused_cols)))
    b2 = jnp.concatenate([jnp.asarray(bmu, jnp.float32).reshape(1, -1),
                          jnp.asarray(blv, jnp.float32).reshape(1, -1)], axis=1)
    b2p = jnp.pad(b2, ((0, 0), (0, padded_out - fused_cols)))

    return {
        "w1": w1p, "b1": b1p, "w2": w2p, "b2": b2p,
        "input_dim": int(input_dim), "latent_dim": int(latent_dim),
    }


@functools.partial(
    jax.jit, static_argnames=("latent_dim", "block_b", "single_buffer_weights"))
def _encode(x, w1, b1, w2, b2, *, latent_dim, block_b, single_buffer_weights):
    B, input_dim = x.shape
    padded_in, padded_hid = w1.shape
    padded_out = w2.shape[1]
    fused_cols = 2 * latent_dim
    cdt = w1.dtype
    cbytes = cdt.itemsize

    # ---- Batch tiling: round to sublane packing (16 rows/vreg for bf16) ----
    row_mult = 16 if cdt == jnp.dtype(jnp.bfloat16) else 8
    bb = min(block_b, _round_up(B, row_mult))
    bb = _round_up(bb, row_mult)
    steps = _cdiv(B, bb)
    # v7x has 2 TensorCores per chip: a 1-step grid leaves one idle.  When B is
    # big enough, shrink the tile so the "parallel" batch axis has >=2 steps.
    if steps < 2 and B >= 2 * row_mult:
        bb = _round_up(_cdiv(B, 2), row_mult)
        steps = _cdiv(B, bb)
    padded_B = steps * bb

    # ---- Pad / cast the activations (zero rows & zero K-cols are inert) ----
    xp = x.astype(cdt)
    if padded_B != B or padded_in != input_dim:
        xp = jnp.pad(xp, ((0, padded_B - B), (0, padded_in - input_dim)))

    # ---- VMEM budget: weights resident (1x or 2x), x/out tiles 2x, headroom --
    weight_bytes = ((padded_in * padded_hid + padded_hid * padded_out) * cbytes
                    + (padded_hid + padded_out) * 4)
    io_bytes = bb * padded_in * cbytes + bb * padded_out * 4
    vmem_cap = _physical_vmem_bytes()
    if single_buffer_weights is None:
        # Auto: single-buffer the constant weight blocks only when
        # double-buffering them would eat a large chunk of physical VMEM
        # (wide layers / v7x's 64 MiB). At typical VAE sizes this stays False.
        single_buffer_weights = (2 * weight_bytes) > (vmem_cap // 2)
    w_bufs = 1 if single_buffer_weights else 2
    vmem_need = w_bufs * weight_bytes + 2 * io_bytes + (4 << 20)
    vmem_limit = int(min(max(vmem_need, 16 << 20), vmem_cap - (8 << 20)))

    # Constant-index-map weight/bias blocks; optionally single-buffered.
    w_kwargs = {"pipeline_mode": pl.Buffered(1)} if single_buffer_weights else {}

    # NOTE: for very large layers (w1 approaching ~20+ MiB on v7x's 64 MiB
    # VMEM) a K-tiling "arbitrary" grid axis over input_dim with an f32 VMEM
    # accumulator would cap the resident footprint; unnecessary at VAE sizes.
    in_specs = [
        pl.BlockSpec((bb, padded_in), lambda i: (i, 0)),                       # x tile
        pl.BlockSpec((padded_in, padded_hid), lambda i: (0, 0), **w_kwargs),   # w1
        pl.BlockSpec((1, padded_hid), lambda i: (0, 0), **w_kwargs),           # b1 (f32)
        pl.BlockSpec((padded_hid, padded_out), lambda i: (0, 0), **w_kwargs),  # fused w2
        pl.BlockSpec((1, padded_out), lambda i: (0, 0), **w_kwargs),           # fused b2
    ]
    out_specs = pl.BlockSpec((bb, padded_out), lambda i: (i, 0))

    # ---- Advisory cost estimate (HBM traffic counted once per array) ----
    flops = 2 * padded_B * (padded_in * padded_hid + padded_hid * padded_out)
    bytes_accessed = (padded_B * padded_in * cbytes
                      + weight_bytes
                      + padded_B * padded_out * 4)
    cost = pl.CostEstimate(flops=flops, transcendentals=0,
                           bytes_accessed=bytes_accessed)

    out = pl.pallas_call(
        _encoder_kernel,
        out_shape=jax.ShapeDtypeStruct((padded_B, padded_out), jnp.float32),
        grid_spec=pltpu.PrefetchScalarGridSpec(
            num_scalar_prefetch=0,
            grid=(steps,),
            in_specs=in_specs,
            out_specs=out_specs,
        ),
        compiler_params=pltpu.CompilerParams(
            dimension_semantics=("parallel",),
            vmem_limit_bytes=vmem_limit,
        ),
        cost_estimate=cost,
    )(xp, w1, b1, w2, b2)

    # Outputs are always f32 (matches the PyTorch module's precision).
    mu = out[:B, :latent_dim]
    log_sigma2 = out[:B, latent_dim:fused_cols]
    return mu, log_sigma2


def fcnn_encoder_apply(x, params, *, block_b=512, single_buffer_weights=None):
    """Apply the encoder with pre-prepared params (preferred hot path)."""
    return _encode(x, params["w1"], params["b1"], params["w2"], params["b2"],
                   latent_dim=params["latent_dim"], block_b=block_b,
                   single_buffer_weights=single_buffer_weights)


def fcnn_encoder(x, w1, b1, wmu, bmu, wlv, blv, *, block_b=512,
                 compute_dtype=None, single_buffer_weights=None):
    """Convenience one-shot wrapper: prepare params + apply.

    compute_dtype: MXU operand dtype (jnp.bfloat16 recommended on v6e/v7x);
                   accumulation / bias / ReLU / outputs stay float32.
    """
    params = prepare_fcnn_encoder_params(w1, b1, wmu, bmu, wlv, blv,
                                         compute_dtype=compute_dtype)
    return fcnn_encoder_apply(x, params, block_b=block_b,
                              single_buffer_weights=single_buffer_weights)


def _reference(x, w1, b1, wmu, bmu, wlv, blv):
    h = jnp.maximum(x @ w1 + b1, 0.0)
    return h @ wmu + bmu, h @ wlv + blv


if __name__ == "__main__":
    # Classic MNIST-style VAE encoder dims (exercises the 128-lane padding of
    # input_dim / hidden_dim / fused latent columns).
    input_dim, hidden_dim, latent_dim = 784, 400, 20

    key = jax.random.PRNGKey(0)
    kx, kx2, k1, k2, k3, k4, k5, k6 = jax.random.split(key, 8)

    # Deterministic synthetic parameters (PyTorch-Linear-like uniform scaling),
    # stored as (in, out) so the kernel computes x @ W.
    def init_linear(kw, kb, fan_in, fan_out):
        bound = 1.0 / jnp.sqrt(fan_in)
        w = jax.random.uniform(kw, (fan_in, fan_out), jnp.float32, -bound, bound)
        b = jax.random.uniform(kb, (1, fan_out), jnp.float32, -bound, bound)
        return w, b

    w1, b1 = init_linear(k1, k2, input_dim, hidden_dim)
    wmu, bmu = init_linear(k3, k4, hidden_dim, latent_dim)
    wlv, blv = init_linear(k5, k6, hidden_dim, latent_dim)

    # --- 1) small batch, f32, prepare-once + apply (hot path) ---
    B = 8
    x = jax.random.normal(kx, (B, input_dim), dtype=jnp.float32)
    mu_ref, lv_ref = _reference(x, w1, b1, wmu, bmu, wlv, blv)

    params = prepare_fcnn_encoder_params(w1, b1, wmu, bmu, wlv, blv)
    mu, log_sigma2 = fcnn_encoder_apply(x, params)
    jax.block_until_ready((mu, log_sigma2))
    assert mu.shape == (B, latent_dim) and log_sigma2.shape == (B, latent_dim)
    assert mu.dtype == jnp.float32 and log_sigma2.dtype == jnp.float32
    assert jnp.allclose(mu, mu_ref, atol=1e-4, rtol=1e-4)
    assert jnp.allclose(log_sigma2, lv_ref, atol=1e-4, rtol=1e-4)

    # --- 2) ragged batch: exercises batch zero-padding + >=2-step parallel grid
    B2 = 200
    x2 = jax.random.normal(kx2, (B2, input_dim), dtype=jnp.float32)
    mu2_ref, lv2_ref = _reference(x2, w1, b1, wmu, bmu, wlv, blv)
    mu2, lv2 = fcnn_encoder_apply(x2, params)
    jax.block_until_ready((mu2, lv2))
    assert mu2.shape == (B2, latent_dim) and lv2.shape == (B2, latent_dim)
    assert jnp.allclose(mu2, mu2_ref, atol=1e-4, rtol=1e-4)
    assert jnp.allclose(lv2, lv2_ref, atol=1e-4, rtol=1e-4)

    # --- 3) bf16 MXU-operand fast path (v6e/v7x); f32 accumulation, looser tol
    mu_b, lv_b = fcnn_encoder(x, w1, b1, wmu, bmu, wlv, blv,
                              compute_dtype=jnp.bfloat16)
    jax.block_until_ready((mu_b, lv_b))
    assert jnp.allclose(mu_b, mu_ref, atol=5e-2, rtol=5e-2)
    assert jnp.allclose(lv_b, lv_ref, atol=5e-2, rtol=5e-2)

    print("KERNEL_OK")
</pallas_src>

<mosaic_0001>
module attributes {stable_mosaic.version = 11 : i64} {
  func.func @_encoder_kernel(%arg0: i32, %arg1: memref<8x896xf32, #tpu.memory_space<vmem>>, %arg2: memref<896x512xf32, #tpu.memory_space<vmem>>, %arg3: memref<1x512xf32, #tpu.memory_space<vmem>>, %arg4: memref<512x128xf32, #tpu.memory_space<vmem>>, %arg5: memref<1x128xf32, #tpu.memory_space<vmem>>, %arg6: memref<8x128xf32, #tpu.memory_space<vmem>>) attributes {dimension_semantics = [#tpu.dimension_semantics<parallel>], iteration_bounds = array<i64: 1>, scalar_prefetch = 0 : i64, scratch_operands = 0 : i64, tpu.core_type = #tpu.core_type<tc>, window_params = [{transform_indices = @transform_0, window_bounds = array<i64: 8, 896>}, {pipeline_mode = #tpu.pipeline_mode<synchronous>, transform_indices = @transform_1, window_bounds = array<i64: 896, 512>}, {pipeline_mode = #tpu.pipeline_mode<synchronous>, transform_indices = @transform_2, window_bounds = array<i64: 1, 512>}, {pipeline_mode = #tpu.pipeline_mode<synchronous>, transform_indices = @transform_3, window_bounds = array<i64: 512, 128>}, {pipeline_mode = #tpu.pipeline_mode<synchronous>, transform_indices = @transform_4, window_bounds = array<i64: 1, 128>}, {transform_indices = @transform_5, window_bounds = array<i64: 8, 128>}]} {
    %c0 = arith.constant 0 : index
    %c0_0 = arith.constant 0 : index
    %0 = vector.load %arg1[%c0, %c0_0] : memref<8x896xf32, #tpu.memory_space<vmem>>, vector<8x896xf32>
    %c0_1 = arith.constant 0 : index
    %c0_2 = arith.constant 0 : index
    %1 = vector.load %arg2[%c0_1, %c0_2] : memref<896x512xf32, #tpu.memory_space<vmem>>, vector<896x512xf32>
    %cst = arith.constant dense<0.000000e+00> : vector<8x512xf32>
    %2 = tpu.matmul %0, %1, %cst {dimension_numbers = #tpu.dot_dimension_numbers<[1], [0], [0], [1], [0, 0, 1, 1], [], []>} : vector<8x896xf32>, vector<896x512xf32>, vector<8x512xf32> -> vector<8x512xf32>
    %c0_3 = arith.constant 0 : index
    %c0_4 = arith.constant 0 : index
    %3 = vector.load %arg3[%c0_3, %c0_4] : memref<1x512xf32, #tpu.memory_space<vmem>>, vector<1x512xf32>
    %4 = vector.broadcast %3 : vector<1x512xf32> to vector<8x512xf32>
    %5 = arith.addf %2, %4 : vector<8x512xf32>
    %cst_5 = arith.constant 0.000000e+00 : f32
    %6 = vector.broadcast %cst_5 : f32 to vector<8x512xf32>
    %7 = arith.maximumf %5, %6 : vector<8x512xf32>
    %c0_6 = arith.constant 0 : index
    %c0_7 = arith.constant 0 : index
    %8 = vector.load %arg4[%c0_6, %c0_7] : memref<512x128xf32, #tpu.memory_space<vmem>>, vector<512x128xf32>
    %cst_8 = arith.constant dense<0.000000e+00> : vector<8x128xf32>
    %9 = tpu.matmul %7, %8, %cst_8 {dimension_numbers = #tpu.dot_dimension_numbers<[1], [0], [0], [1], [0, 0, 1, 1], [], []>} : vector<8x512xf32>, vector<512x128xf32>, vector<8x128xf32> -> vector<8x128xf32>
    %c0_9 = arith.constant 0 : index
    %c0_10 = arith.constant 0 : index
    %10 = vector.load %arg5[%c0_9, %c0_10] : memref<1x128xf32, #tpu.memory_space<vmem>>, vector<1x128xf32>
    %11 = vector.broadcast %10 : vector<1x128xf32> to vector<8x128xf32>
    %12 = arith.addf %9, %11 : vector<8x128xf32>
    %c0_11 = arith.constant 0 : index
    %c0_12 = arith.constant 0 : index
    %13 = vector.load %arg6[%c0_11, %c0_12] : memref<8x128xf32, #tpu.memory_space<vmem>>, vector<8x128xf32>
    tpu.vector_store %arg6[%c0_11, %c0_12], %12 {strides = array<i32>} : memref<8x128xf32, #tpu.memory_space<vmem>>, vector<8x128xf32>,
    return
  }
  func.func @transform_0(%arg0: i32) -> (i32, i32) {
    %c0_i32 = arith.constant 0 : i32
    %c0_i32_0 = arith.constant 0 : i32
    return %arg0, %c0_i32 : i32, i32
  }
  func.func @transform_1(%arg0: i32) -> (i32, i32) {
    %c0_i32 = arith.constant 0 : i32
    %c0_i32_0 = arith.constant 0 : i32
    %c0_i32_1 = arith.constant 0 : i32
    return %c0_i32, %c0_i32_0 : i32, i32
  }
  func.func @transform_2(%arg0: i32) -> (i32, i32) {
    %c0_i32 = arith.constant 0 : i32
    %c0_i32_0 = arith.constant 0 : i32
    %c0_i32_1 = arith.constant 0 : i32
    return %c0_i32, %c0_i32_0 : i32, i32
  }
  func.func @transform_3(%arg0: i32) -> (i32, i32) {
    %c0_i32 = arith.constant 0 : i32
    %c0_i32_0 = arith.constant 0 : i32
    %c0_i32_1 = arith.constant 0 : i32
    return %c0_i32, %c0_i32_0 : i32, i32
  }
  func.func @transform_4(%arg0: i32) -> (i32, i32) {
    %c0_i32 = arith.constant 0 : i32
    %c0_i32_0 = arith.constant 0 : i32
    %c0_i32_1 = arith.constant 0 : i32
    return %c0_i32, %c0_i32_0 : i32, i32
  }
  func.func @transform_5(%arg0: i32) -> (i32, i32) {
    %c0_i32 = arith.constant 0 : i32
    %c0_i32_0 = arith.constant 0 : i32
    return %arg0, %c0_i32 : i32, i32
  }
}

</mosaic_0001>

<bundles_post_ra>
// kernel: _encode.1
= control target key start
LH: loop header
LB: loop body
LE: loop exit
PB: predicated region body
PF: predicated region fallthrough
CT: control target
= control target key end

     0   :  { %10 = vsyncpa [#allocation3], 0  ;;  %s2159_s0 = inlined_call_operand.vmem [shape: f32[8,896], index: 0, kind: input, shape index: {}]   ;;  %s2160_s1 = inlined_call_operand.hbm [shape: f32[896,512], index: 1, kind: input, shape index: {}]   ;;  %s2161_s2 = inlined_call_operand.hbm [shape: f32[1,512], index: 2, kind: input, shape index: {}]   ;;  %s2162_s3 = inlined_call_operand.hbm [shape: f32[512,128], index: 3, kind: input, shape index: {}]   ;;  %s2163_s4 = inlined_call_operand.hbm [shape: f32[1,128], index: 4, kind: input, shape index: {}]   ;;  %s2164_s5 = inlined_call_operand.vmem [shape: f32[8,128], index: 5, kind: output, shape index: {}]  }
   0x1   :  { %11 = vsyncpa [#allocation5], 0 }
   0x2   :  { %12 = vsyncpa [#allocation8], 0  ;;  %s2041_s18 = smov [#allocation4]   ;;  %s2042_s20 = smov [#allocation2]  }
   0x3   :  { %s33_s19 = sshll.u32 %s2041_s18, 4  ;;  %s20_s21 = sshll.u32 %s2042_s20, 4  ;;  %s34_s19 = int_to_ptr.vmem [resolvable:$true] %s33_s19  ;;  %s2080_s21 = int_to_ptr.vmem [resolvable:$true] %s20_s21 }
   0x4   :  { %s1947_s24 = scalar_lea.hbm %s2161_s2, 64 }
   0x5   :  { %p1948_p0 = scmp.ne.s32.totalorder %s2161_s2, %s1947_s24  ;;  %p1951_p1 = scmp.lt.u32.totalorder %s1947_s24, %s2161_s2 }
   0x7   :  { %p1953_p2 = pnand %p1951_p1, %p1948_p0 }
   0x9   :  { %1956 = shalt.err (!%p1953_p2)
}
   0xa   :  { %s1957_s29 = scalar_lea.vmem %s34_s19, 64  ;;  %p1962_p4 = scmp.lt.s32.totalorder %s34_s19, %s34_s19 }
   0xb   :  { %p1958_p3 = scmp.ne.s32.totalorder %s34_s19, %s1957_s29  ;;  %p1963_p5 = scmp.lt.s32.totalorder %s1957_s29, %s1957_s29 }
   0xd   :  { %p1964_p6 = por %p1963_p5, %p1962_p4 }
   0xf   :  { %p1965_p7 = pnand %p1964_p6, %p1958_p3 }
  0x11   :  { %1968 = shalt.err (!%p1965_p7)
}
  0x12   :  { %36 = dma.hbm_to_vmem [thread:$0]  %s2161_s2, 64, %s34_s19, [#allocation5]  }
  0x13   :  { %s1969_s9 = scalar_lea.hbm %s2160_s1, 57344 }
  0x14   :  { %p1970_p8 = scmp.ne.s32.totalorder %s2160_s1, %s1969_s9  ;;  %p1973_p9 = scmp.lt.u32.totalorder %s1969_s9, %s2160_s1 }
  0x16   :  { %p1975_p10 = pnand %p1973_p9, %p1970_p8 }
  0x18   :  { %1978 = shalt.err (!%p1975_p10)
}
  0x19   :  { %s1979_s14 = scalar_lea.vmem %s2080_s21, 57344  ;;  %p1984_p12 = scmp.lt.s32.totalorder %s2080_s21, %s2080_s21 }
  0x1a   :  { %p1980_p11 = scmp.ne.s32.totalorder %s2080_s21, %s1979_s14  ;;  %p1985_p13 = scmp.lt.s32.totalorder %s1979_s14, %s1979_s14 }
  0x1c   :  { %p1986_p0 = por %p1985_p13, %p1984_p12 }
  0x1e   :  { %p1987_p1 = pnand %p1986_p0, %p1980_p11 }
  0x20   :  { %1990 = shalt.err (!%p1987_p1)
}
  0x21   :  { %s2043_s2 = smov 512   ;;  %s2044_s15 = smov 32  }
  0x22   :  { %26 = dma.hbm_to_vmem [thread:$0]  %s2160_s1, 57344, %s2080_s21, [#allocation3], %s2043_s2, %s2043_s2, %s2044_s15  }
  0x23   :  { %s2045_s18 = smov [#allocation6]   ;;  %s1991_s23 = scalar_lea.hbm %s2162_s3, 8192 }
  0x24   :  { %s42_s19 = sshll.u32 %s2045_s18, 4  ;;  %p1992_p2 = scmp.ne.s32.totalorder %s2162_s3, %s1991_s23  ;;  %s43_s19 = int_to_ptr.vmem [resolvable:$true] %s42_s19 }
  0x25   :  { %p1995_p3 = scmp.lt.u32.totalorder %s1991_s23, %s2162_s3 }
  0x27   :  { %p1997_p4 = pnand %p1995_p3, %p1992_p2 }
  0x29   :  { %2000 = shalt.err (!%p1997_p4)
}
  0x2a   :  { %s2001_s28 = scalar_lea.vmem %s43_s19, 8192  ;;  %p2006_p6 = scmp.lt.s32.totalorder %s43_s19, %s43_s19 }
  0x2b   :  { %p2002_p5 = scmp.ne.s32.totalorder %s43_s19, %s2001_s28  ;;  %p2007_p7 = scmp.lt.s32.totalorder %s2001_s28, %s2001_s28 }
  0x2d   :  { %p2008_p8 = por %p2007_p7, %p2006_p6 }
  0x2f   :  { %p2009_p9 = pnand %p2008_p8, %p2002_p5 }
  0x31   :  { %2012 = shalt.err (!%p2009_p9)
}
  0x32   :  { %s2046_s1 = smov 128   ;;  %s2047_s21 = smov 8  }
  0x33   :  { %48 = dma.hbm_to_vmem [thread:$0]  %s2162_s3, 8192, %s43_s19, [#allocation5], %s2046_s1, %s2046_s1, %s2047_s21  }
  0x34   :  { %s2048_s6 = smov [#allocation7]   ;;  %s2013_s10 = scalar_lea.hbm %s2163_s4, 16 }
  0x35   :  { %s55_s7 = sshll.u32 %s2048_s6, 4  ;;  %p2014_p10 = scmp.ne.s32.totalorder %s2163_s4, %s2013_s10  ;;  %s56_s7 = int_to_ptr.vmem [resolvable:$true] %s55_s7 }
  0x36   :  { %p2017_p11 = scmp.lt.u32.totalorder %s2013_s10, %s2163_s4 }
  0x38   :  { %p2019_p12 = pnand %p2017_p11, %p2014_p10 }
  0x3a   :  { %2022 = shalt.err (!%p2019_p12)
}
  0x3b   :  { %s2023_s2 = scalar_lea.vmem %s56_s7, 16  ;;  %s2027_s3 = scalar_lea.vmem %s56_s7, 32 }
  0x3c   :  { %p2024_p13 = scmp.ne.s32.totalorder %s56_s7, %s2023_s2  ;;  %p2028_p0 = scmp.lt.s32.totalorder %s56_s7, %s56_s7 }
  0x3d   :  { %p2029_p1 = scmp.lt.s32.totalorder %s2027_s3, %s2023_s2 }
  0x3f   :  { %p2030_p2 = por %p2029_p1, %p2028_p0 }
  0x41   :  { %p2031_p3 = pnand %p2030_p2, %p2024_p13 }
  0x43   :  { %2034 = shalt.err (!%p2031_p3)
}
  0x44   :  { %58 = dma.hbm_to_vmem [thread:$0]  %s2163_s4, 16, %s56_s7, [#allocation8]  }
  0x45   :  { %2035 = dma.done.wait [#allocation3], 57344  }
  0x46   :  { %2036 = vsyncadd [#allocation3], 4294909952 }
  0x47   :  { %2037 = dma.done.wait [#allocation5], 8256  }
  0x48   :  { %2038 = vsyncadd [#allocation5], 4294959040 }
  0x49   :  { %2039 = dma.done.wait [#allocation8], 16  }
  0x4a   :  { %2040 = vsyncadd [#allocation8], 4294967280  ;;  %v79_v0 = vld [vmem:[#allocation2 + $0x8] sm:$0xff]  ;;  %v81_v2 = vld [vmem:[#allocation2 + $0x18] sm:$0xff] }
  0x4b   :  { %v83_v1 = vld [vmem:[#allocation2 + $0x28] sm:$0xff]  ;;  %v85_v4 = vld [vmem:[#allocation2 + $0x38] sm:$0xff]  ;;  %v78_v5 = vld [vmem:[#allocation2] sm:$0xff] }
  0x4c   :  { %v1410_v3 = vpack.c.bf16 %v83_v1, %v79_v0  ;;  %v82_v6 = vld [vmem:[#allocation2 + $0x20] sm:$0xff]  ;;  %v1634_v7 = vpack.c.bf16 %v85_v4, %v81_v2  ;;  %v80_v9 = vld [vmem:[#allocation2 + $0x10] sm:$0xff]  ;;  %v87_v11 = vld [vmem:[#allocation2 + $0x48] sm:$0xff] }
  0x4d   :  { %v1412_v8 = vpack.c.bf16 %v82_v6, %v78_v5  ;;  %v84_v10 = vld [vmem:[#allocation2 + $0x30] sm:$0xff]  ;;  %v91_v13 = vld [vmem:[#allocation2 + $0x68] sm:$0xff]  ;;  %v89_v14 = vld [vmem:[#allocation2 + $0x58] sm:$0xff] }
  0x4e   :  { %1411 = vmatprep.subr.bf16.mxu0 %v1410_v3  ;;  %v1636_v12 = vpack.c.bf16 %v84_v10, %v80_v9  ;;  %v93_v15 = vld [vmem:[#allocation2 + $0x78] sm:$0xff]  ;;  %1635 = vmatprep.subr.bf16.mxu1 %v1634_v7  ;;  %v1414_v16 = vpack.c.bf16 %v91_v13, %v87_v11  ;;  %v86_v18 = vld [vmem:[#allocation2 + $0x40] sm:$0xff]  ;;  %v88_v20 = vld [vmem:[#allocation2 + $0x50] sm:$0xff] }
  0x4f   :  { %1413 = vmatpush1.bf16.msra.mxu0 %v1412_v8  ;;  %v1638_v17 = vpack.c.bf16 %v93_v15, %v89_v14  ;;  %v90_v19 = vld [vmem:[#allocation2 + $0x60] sm:$0xff]  ;;  %v92_v22 = vld [vmem:[#allocation2 + $0x70] sm:$0xff]  ;;  %v95_v23 = vld [vmem:[#allocation2 + $0x88] sm:$0xff] }
  0x50   :  { %1637 = vmatpush1.bf16.msra.mxu1 %v1636_v12  ;;  %v1416_v21 = vpack.c.bf16 %v90_v19, %v86_v18  ;;  %v99_v24 = vld [vmem:[#allocation2 + $0xa8] sm:$0xff]  ;;  %1415 = vmatprep.subr.bf16.mxu0 %v1414_v16  ;;  %v1640_v25 = vpack.c.bf16 %v92_v22, %v88_v20  ;;  %v97_v27 = vld [vmem:[#allocation2 + $0x98] sm:$0xff]  ;;  %v94_v29 = vld [vmem:[#allocation2 + $0x80] sm:$0xff] }
  0x51   :  { %1639 = vmatprep.subr.bf16.mxu1 %v1638_v17  ;;  %v1418_v26 = vpack.c.bf16 %v99_v24, %v95_v23  ;;  %v101_v28 = vld [vmem:[#allocation2 + $0xb8] sm:$0xff]  ;;  %v98_v31 = vld [vmem:[#allocation2 + $0xa0] sm:$0xff]  ;;  %v96_v32 = vld [vmem:[#allocation2 + $0x90] sm:$0xff] }
  0x52   :  { %v1642_v30 = vpack.c.bf16 %v101_v28, %v97_v27  ;;  %v100_v33 = vld [vmem:[#allocation2 + $0xb0] sm:$0xff]  ;;  %v1420_v34 = vpack.c.bf16 %v98_v31, %v94_v29  ;;  %v103_v35 = vld [vmem:[#allocation2 + $0xc8] sm:$0xff]  ;;  %v105_v37 = vld [vmem:[#allocation2 + $0xd8] sm:$0xff] }
  0x53   :  { %1417 = vmatpush1.bf16.msra.mxu0 %v1416_v21  ;;  %v107_v36 = vld [vmem:[#allocation2 + $0xe8] sm:$0xff]  ;;  %v1644_v38 = vpack.c.bf16 %v100_v33, %v96_v32  ;;  %v109_v40 = vld [vmem:[#allocation2 + $0xf8] sm:$0xff]  ;;  %v102_v41 = vld [vmem:[#allocation2 + $0xc0] sm:$0xff] }
  0x54   :  { %1641 = vmatpush1.bf16.msra.mxu1 %v1640_v25  ;;  %1419 = vmatprep.subr.bf16.mxu0 %v1418_v26  ;;  %v1422_v39 = vpack.c.bf16 %v107_v36, %v103_v35  ;;  %v106_v42 = vld [vmem:[#allocation2 + $0xe0] sm:$0xff]  ;;  %v1646_v43 = vpack.c.bf16 %v109_v40, %v105_v37  ;;  %v104_v44 = vld [vmem:[#allocation2 + $0xd0] sm:$0xff]  ;;  %v111_v46 = vld [vmem:[#allocation2 + $0x108] sm:$0xff] }
  0x55   :  { %1643 = vmatprep.subr.bf16.mxu1 %v1642_v30  ;;  %v108_v45 = vld [vmem:[#allocation2 + $0xf0] sm:$0xff]  ;;  %v115_v47 = vld [vmem:[#allocation2 + $0x128] sm:$0xff]  ;;  %v113_v48 = vld [vmem:[#allocation2 + $0x118] sm:$0xff]  ;;  %v1424_v50 = vpack.c.bf16 %v106_v42, %v102_v41 }
  0x56   :  { %v117_v49 = vld [vmem:[#allocation2 + $0x138] sm:$0xff]  ;;  %v1648_v51 = vpack.c.bf16 %v108_v45, %v104_v44  ;;  %v1426_v52 = vpack.c.bf16 %v115_v47, %v111_v46  ;;  %v110_v53 = vld [vmem:[#allocation2 + $0x100] sm:$0xff]  ;;  %v112_v55 = vld [vmem:[#allocation2 + $0x110] sm:$0xff] }
  0x57   :  { %1421 = vmatpush1.bf16.msra.mxu0 %v1420_v34  ;;  %v114_v54 = vld [vmem:[#allocation2 + $0x120] sm:$0xff]  ;;  %v1650_v56 = vpack.c.bf16 %v117_v49, %v113_v48  ;;  %v116_v57 = vld [vmem:[#allocation2 + $0x130] sm:$0xff]  ;;  %v119_v58 = vld [vmem:[#allocation2 + $0x148] sm:$0xff] }
  0x58   :  { %1645 = vmatpush1.bf16.msra.mxu1 %v1644_v38  ;;  %1423 = vmatprep.subr.bf16.mxu0 %v1422_v39  ;;  %v123_v59 = vld [vmem:[#allocation2 + $0x168] sm:$0xff]  ;;  %v121_v60 = vld [vmem:[#allocation2 + $0x158] sm:$0xff]  ;;  %v1428_v62 = vpack.c.bf16 %v114_v54, %v110_v53  ;;  %v1652_v63 = vpack.c.bf16 %v116_v57, %v112_v55  ;;  %v118_v1 = vld [vmem:[#allocation2 + $0x140] sm:$0xff] }
  0x59   :  { %1647 = vmatprep.subr.bf16.mxu1 %v1646_v43  ;;  %v125_v61 = vld [vmem:[#allocation2 + $0x178] sm:$0xff]  ;;  %v1430_v0 = vpack.c.bf16 %v123_v59, %v119_v58  ;;  %v122_v2 = vld [vmem:[#allocation2 + $0x160] sm:$0xff]  ;;  %v120_v3 = vld [vmem:[#allocation2 + $0x150] sm:$0xff] }
  0x5a   :  { %v1654_v4 = vpack.c.bf16 %v125_v61, %v121_v60  ;;  %v124_v5 = vld [vmem:[#allocation2 + $0x170] sm:$0xff]  ;;  %v127_v6 = vld [vmem:[#allocation2 + $0x188] sm:$0xff]  ;;  %v129_v8 = vld [vmem:[#allocation2 + $0x198] sm:$0xff]  ;;  %v1432_v10 = vpack.c.bf16 %v122_v2, %v118_v1 }
  0x5b   :  { %1425 = vmatpush1.bf16.msra.mxu0 %v1424_v50  ;;  %v131_v7 = vld [vmem:[#allocation2 + $0x1a8] sm:$0xff]  ;;  %v133_v9 = vld [vmem:[#allocation2 + $0x1b8] sm:$0xff]  ;;  %v1656_v11 = vpack.c.bf16 %v124_v5, %v120_v3  ;;  %v126_v13 = vld [vmem:[#allocation2 + $0x180] sm:$0xff] }
  0x5c   :  { %1649 = vmatpush1.bf16.msra.mxu1 %v1648_v51  ;;  %1427 = vmatprep.subr.bf16.mxu0 %v1426_v52  ;;  %v1434_v12 = vpack.c.bf16 %v131_v7, %v127_v6  ;;  %v130_v14 = vld [vmem:[#allocation2 + $0x1a0] sm:$0xff]  ;;  %v128_v15 = vld [vmem:[#allocation2 + $0x190] sm:$0xff]  ;;  %v1658_v16 = vpack.c.bf16 %v133_v9, %v129_v8  ;;  %v135_v18 = vld [vmem:[#allocation2 + $0x1c8] sm:$0xff] }
  0x5d   :  { %1651 = vmatprep.subr.bf16.mxu1 %v1650_v56  ;;  %v132_v17 = vld [vmem:[#allocation2 + $0x1b0] sm:$0xff]  ;;  %v139_v19 = vld [vmem:[#allocation2 + $0x1e8] sm:$0xff]  ;;  %v137_v20 = vld [vmem:[#allocation2 + $0x1d8] sm:$0xff]  ;;  %v1436_v22 = vpack.c.bf16 %v130_v14, %v126_v13 }
  0x5e   :  { %v141_v21 = vld [vmem:[#allocation2 + $0x1f8] sm:$0xff]  ;;  %v1660_v23 = vpack.c.bf16 %v132_v17, %v128_v15  ;;  %v1438_v24 = vpack.c.bf16 %v139_v19, %v135_v18  ;;  %v134_v25 = vld [vmem:[#allocation2 + $0x1c0] sm:$0xff]  ;;  %v136_v27 = vld [vmem:[#allocation2 + $0x1d0] sm:$0xff] }
  0x5f   :  { %1429 = vmatpush1.bf16.msra.mxu0 %v1428_v62  ;;  %v138_v26 = vld [vmem:[#allocation2 + $0x1e0] sm:$0xff]  ;;  %v1662_v28 = vpack.c.bf16 %v141_v21, %v137_v20  ;;  %v140_v29 = vld [vmem:[#allocation2 + $0x1f0] sm:$0xff]  ;;  %v143_v30 = vld [vmem:[#allocation2 + $0x208] sm:$0xff] }
  0x60   :  { %1653 = vmatpush1.bf16.msra.mxu1 %v1652_v63  ;;  %1431 = vmatprep.subr.bf16.mxu0 %v1430_v0  ;;  %v147_v31 = vld [vmem:[#allocation2 + $0x228] sm:$0xff]  ;;  %v145_v32 = vld [vmem:[#allocation2 + $0x218] sm:$0xff]  ;;  %v1440_v34 = vpack.c.bf16 %v138_v26, %v134_v25  ;;  %v1664_v35 = vpack.c.bf16 %v140_v29, %v136_v27  ;;  %v142_v37 = vld [vmem:[#allocation2 + $0x200] sm:$0xff] }
  0x61   :  { %1655 = vmatprep.subr.bf16.mxu1 %v1654_v4  ;;  %v149_v33 = vld [vmem:[#allocation2 + $0x238] sm:$0xff]  ;;  %v1442_v36 = vpack.c.bf16 %v147_v31, %v143_v30  ;;  %v146_v38 = vld [vmem:[#allocation2 + $0x220] sm:$0xff]  ;;  %v144_v39 = vld [vmem:[#allocation2 + $0x210] sm:$0xff] }
  0x62   :  { %v1666_v40 = vpack.c.bf16 %v149_v33, %v145_v32  ;;  %v148_v41 = vld [vmem:[#allocation2 + $0x230] sm:$0xff]  ;;  %v151_v42 = vld [vmem:[#allocation2 + $0x248] sm:$0xff]  ;;  %v153_v44 = vld [vmem:[#allocation2 + $0x258] sm:$0xff]  ;;  %v1444_v46 = vpack.c.bf16 %v146_v38, %v142_v37 }
  0x63   :  { %1433 = vmatpush1.bf16.msra.mxu0 %v1432_v10  ;;  %v155_v43 = vld [vmem:[#allocation2 + $0x268] sm:$0xff]  ;;  %v157_v45 = vld [vmem:[#allocation2 + $0x278] sm:$0xff]  ;;  %v1668_v47 = vpack.c.bf16 %v148_v41, %v144_v39  ;;  %v150_v49 = vld [vmem:[#allocation2 + $0x240] sm:$0xff] }
  0x64   :  { %1657 = vmatpush1.bf16.msra.mxu1 %v1656_v11  ;;  %1435 = vmatprep.subr.bf16.mxu0 %v1434_v12  ;;  %v1446_v48 = vpack.c.bf16 %v155_v43, %v151_v42  ;;  %v154_v50 = vld [vmem:[#allocation2 + $0x260] sm:$0xff]  ;;  %v152_v51 = vld [vmem:[#allocation2 + $0x250] sm:$0xff]  ;;  %v1670_v52 = vpack.c.bf16 %v157_v45, %v153_v44  ;;  %v159_v54 = vld [vmem:[#allocation2 + $0x288] sm:$0xff] }
  0x65   :  { %1659 = vmatprep.subr.bf16.mxu1 %v1658_v16  ;;  %v156_v53 = vld [vmem:[#allocation2 + $0x270] sm:$0xff]  ;;  %v163_v55 = vld [vmem:[#allocation2 + $0x2a8] sm:$0xff]  ;;  %v161_v56 = vld [vmem:[#allocation2 + $0x298] sm:$0xff]  ;;  %v1448_v58 = vpack.c.bf16 %v154_v50, %v150_v49 }
  0x66   :  { %v165_v57 = vld [vmem:[#allocation2 + $0x2b8] sm:$0xff]  ;;  %v1672_v59 = vpack.c.bf16 %v156_v53, %v152_v51  ;;  %v1450_v60 = vpack.c.bf16 %v163_v55, %v159_v54  ;;  %v158_v61 = vld [vmem:[#allocation2 + $0x280] sm:$0xff]  ;;  %v160_v63 = vld [vmem:[#allocation2 + $0x290] sm:$0xff] }
  0x67   :  { %1437 = vmatpush1.bf16.msra.mxu0 %v1436_v22  ;;  %v162_v62 = vld [vmem:[#allocation2 + $0x2a0] sm:$0xff]  ;;  %v1674_v0 = vpack.c.bf16 %v165_v57, %v161_v56  ;;  %v164_v1 = vld [vmem:[#allocation2 + $0x2b0] sm:$0xff]  ;;  %v167_v2 = vld [vmem:[#allocation2 + $0x2c8] sm:$0xff] }
  0x68   :  { %1661 = vmatpush1.bf16.msra.mxu1 %v1660_v23  ;;  %1439 = vmatprep.subr.bf16.mxu0 %v1438_v24  ;;  %v171_v3 = vld [vmem:[#allocation2 + $0x2e8] sm:$0xff]  ;;  %v169_v4 = vld [vmem:[#allocation2 + $0x2d8] sm:$0xff]  ;;  %v1452_v6 = vpack.c.bf16 %v162_v62, %v158_v61  ;;  %v166_v7 = vld [vmem:[#allocation2 + $0x2c0] sm:$0xff]  ;;  %v1676_v8 = vpack.c.bf16 %v164_v1, %v160_v63 }
  0x69   :  { %1663 = vmatprep.subr.bf16.mxu1 %v1662_v28  ;;  %v173_v5 = vld [vmem:[#allocation2 + $0x2f8] sm:$0xff]  ;;  %v1454_v9 = vpack.c.bf16 %v171_v3, %v167_v2  ;;  %v170_v10 = vld [vmem:[#allocation2 + $0x2e0] sm:$0xff]  ;;  %v168_v11 = vld [vmem:[#allocation2 + $0x2d0] sm:$0xff] }
  0x6a   :  { %v172_v12 = vld [vmem:[#allocation2 + $0x2f0] sm:$0xff]  ;;  %v1678_v13 = vpack.c.bf16 %v173_v5, %v169_v4  ;;  %v175_v14 = vld [vmem:[#allocation2 + $0x308] sm:$0xff]  ;;  %v177_v17 = vld [vmem:[#allocation2 + $0x318] sm:$0xff]  ;;  %v1456_v19 = vpack.c.bf16 %v170_v10, %v166_v7 }
  0x6b   :  { %1441 = vmatpush1.bf16.msra.mxu0 %v1440_v34  ;;  %v179_v15 = vld [vmem:[#allocation2 + $0x328] sm:$0xff]  ;;  %v181_v18 = vld [vmem:[#allocation2 + $0x338] sm:$0xff]  ;;  %v1680_v20 = vpack.c.bf16 %v172_v12, %v168_v11  ;;  %v174_v22 = vld [vmem:[#allocation2 + $0x300] sm:$0xff] }
  0x6c   :  { %1665 = vmatpush1.bf16.msra.mxu1 %v1664_v35  ;;  %1443 = vmatprep.subr.bf16.mxu0 %v1442_v36  ;;  %v72_v16 = vld [vmem:[%s2159_s0 + $0x8] sm:$0xff]  ;;  %v1458_v21 = vpack.c.bf16 %v179_v15, %v175_v14  ;;  %v178_v23 = vld [vmem:[#allocation2 + $0x320] sm:$0xff]  ;;  %v176_v24 = vld [vmem:[#allocation2 + $0x310] sm:$0xff]  ;;  %v1682_v25 = vpack.c.bf16 %v181_v18, %v177_v17 }
  0x6d   :  { %1667 = vmatprep.subr.bf16.mxu1 %v1666_v40  ;;  %612 = vmatprep.mubr.f32.mxu0 %v72_v16  ;;  %v180_v26 = vld [vmem:[#allocation2 + $0x330] sm:$0xff]  ;;  %v183_v27 = vld [vmem:[#allocation2 + $0x348] sm:$0xff]  ;;  %v185_v29 = vld [vmem:[#allocation2 + $0x358] sm:$0xff]  ;;  %v1460_v31 = vpack.c.bf16 %v178_v23, %v174_v22 }
  0x6e   :  { %896 = vmatprep.mubr.f32.mxu1 %v72_v16  ;;  %v187_v28 = vld [vmem:[#allocation2 + $0x368] sm:$0xff]  ;;  %v189_v30 = vld [vmem:[#allocation2 + $0x378] sm:$0xff]  ;;  %v1684_v32 = vpack.c.bf16 %v180_v26, %v176_v24  ;;  %v182_v34 = vld [vmem:[#allocation2 + $0x340] sm:$0xff] }
  0x6f   :  { %1445 = vmatpush1.bf16.msra.mxu0 %v1444_v46  ;;  %v1462_v33 = vpack.c.bf16 %v187_v28, %v183_v27  ;;  %v186_v35 = vld [vmem:[#allocation2 + $0x360] sm:$0xff]  ;;  %v184_v36 = vld [vmem:[#allocation2 + $0x350] sm:$0xff]  ;;  %v1686_v37 = vpack.c.bf16 %v189_v30, %v185_v29  ;;  %v191_v39 = vld [vmem:[#allocation2 + $0x388] sm:$0xff] }
  0x70   :  { %1669 = vmatpush1.bf16.msra.mxu1 %v1668_v47  ;;  %1447 = vmatprep.subr.bf16.mxu0 %v1446_v48  ;;  %v188_v38 = vld [vmem:[#allocation2 + $0x370] sm:$0xff]  ;;  %v195_v40 = vld [vmem:[#allocation2 + $0x3a8] sm:$0xff]  ;;  %v193_v41 = vld [vmem:[#allocation2 + $0x398] sm:$0xff]  ;;  %v1464_v43 = vpack.c.bf16 %v186_v35, %v182_v34 }
  0x71   :  { %1671 = vmatprep.subr.bf16.mxu1 %v1670_v52  ;;  %v197_v42 = vld [vmem:[#allocation2 + $0x3b8] sm:$0xff]  ;;  %v1688_v44 = vpack.c.bf16 %v188_v38, %v184_v36  ;;  %v1466_v45 = vpack.c.bf16 %v195_v40, %v191_v39  ;;  %v190_v46 = vld [vmem:[#allocation2 + $0x380] sm:$0xff]  ;;  %v192_v48 = vld [vmem:[#allocation2 + $0x390] sm:$0xff] }
  0x72   :  { %v194_v47 = vld [vmem:[#allocation2 + $0x3a0] sm:$0xff]  ;;  %v1690_v49 = vpack.c.bf16 %v197_v42, %v193_v41  ;;  %v196_v50 = vld [vmem:[#allocation2 + $0x3b0] sm:$0xff]  ;;  %v199_v51 = vld [vmem:[#allocation2 + $0x3c8] sm:$0xff] }
  0x73   :  { %1449 = vmatpush1.bf16.msra.mxu0 %v1448_v58  ;;  %v203_v52 = vld [vmem:[#allocation2 + $0x3e8] sm:$0xff]  ;;  %v201_v53 = vld [vmem:[#allocation2 + $0x3d8] sm:$0xff]  ;;  %v1468_v55 = vpack.c.bf16 %v194_v47, %v190_v46  ;;  %v1692_v56 = vpack.c.bf16 %v196_v50, %v192_v48  ;;  %v198_v58 = vld [vmem:[#allocation2 + $0x3c0] sm:$0xff] }
  0x74   :  { %1673 = vmatpush1.bf16.msra.mxu1 %v1672_v59  ;;  %1451 = vmatprep.subr.bf16.mxu0 %v1450_v60  ;;  %v205_v54 = vld [vmem:[#allocation2 + $0x3f8] sm:$0xff]  ;;  %v1470_v57 = vpack.c.bf16 %v203_v52, %v199_v51  ;;  %v202_v59 = vld [vmem:[#allocation2 + $0x3e0] sm:$0xff]  ;;  %v200_v60 = vld [vmem:[#allocation2 + $0x3d0] sm:$0xff] }
  0x75   :  { %1675 = vmatprep.subr.bf16.mxu1 %v1674_v0  ;;  %v1694_v61 = vpack.c.bf16 %v205_v54, %v201_v53  ;;  %v204_v62 = vld [vmem:[#allocation2 + $0x3f0] sm:$0xff]  ;;  %v207_v63 = vld [vmem:[#allocation2 + $0x408] sm:$0xff]  ;;  %v209_v1 = vld [vmem:[#allocation2 + $0x418] sm:$0xff]  ;;  %v1472_v3 = vpack.c.bf16 %v202_v59, %v198_v58 }
  0x76   :  { %v211_v0 = vld [vmem:[#allocation2 + $0x428] sm:$0xff]  ;;  %v213_v2 = vld [vmem:[#allocation2 + $0x438] sm:$0xff]  ;;  %v1696_v4 = vpack.c.bf16 %v204_v62, %v200_v60  ;;  %v210_v7 = vld [vmem:[#allocation2 + $0x420] sm:$0xff] }
  0x77   :  { %1453 = vmatpush1.bf16.msra.mxu0 %v1452_v6  ;;  %v1474_v5 = vpack.c.bf16 %v211_v0, %v207_v63  ;;  %v206_v6 = vld [vmem:[#allocation2 + $0x400] sm:$0xff]  ;;  %v212_v10 = vld [vmem:[#allocation2 + $0x430] sm:$0xff]  ;;  %v215_v11 = vld [vmem:[#allocation2 + $0x448] sm:$0xff] }
  0x78   :  { %1677 = vmatpush1.bf16.msra.mxu1 %v1676_v8  ;;  %1455 = vmatprep.subr.bf16.mxu0 %v1454_v9  ;;  %v208_v8 = vld [vmem:[#allocation2 + $0x410] sm:$0xff]  ;;  %v1698_v9 = vpack.c.bf16 %v213_v2, %v209_v1  ;;  %v219_v12 = vld [vmem:[#allocation2 + $0x468] sm:$0xff]  ;;  %v221_v14 = vld [vmem:[#allocation2 + $0x478] sm:$0xff]  ;;  %v1476_v16 = vpack.c.bf16 %v210_v7, %v206_v6 }
  0x79   :  { %1679 = vmatprep.subr.bf16.mxu1 %v1678_v13  ;;  %v217_v13 = vld [vmem:[#allocation2 + $0x458] sm:$0xff]  ;;  %v71_v15 = vld [vmem:[%s2159_s0] sm:$0xff]  ;;  %v1700_v17 = vpack.c.bf16 %v212_v10, %v208_v8  ;;  %v1478_v18 = vpack.c.bf16 %v219_v12, %v215_v11  ;;  %v220_v23 = vld [vmem:[#allocation2 + $0x470] sm:$0xff] }
  0x7a   :  { %v1702_v22 = vpack.c.bf16 %v221_v14, %v217_v13  ;;  %v223_v24 = vld [vmem:[#allocation2 + $0x488] sm:$0xff]  ;;  %v225_v26 = vld [vmem:[#allocation2 + $0x498] sm:$0xff]  ;;  %v228_v35 = vld [vmem:[#allocation2 + $0x4b0] sm:$0xff] }
  0x7b   :  { %1457 = vmatpush1.bf16.msra.mxu0 %v1456_v19  ;;  %v214_v19 = vld [vmem:[#allocation2 + $0x440] sm:$0xff]  ;;  %v229_v27 = vld [vmem:[#allocation2 + $0x4b8] sm:$0xff]  ;;  %v231_v36 = vld [vmem:[#allocation2 + $0x4c8] sm:$0xff] }
  0x7c   :  { %1681 = vmatpush1.bf16.msra.mxu1 %v1680_v20  ;;  %1459 = vmatprep.subr.bf16.mxu0 %v1458_v21  ;;  %v218_v20 = vld [vmem:[#allocation2 + $0x460] sm:$0xff]  ;;  %v216_v21 = vld [vmem:[#allocation2 + $0x450] sm:$0xff]  ;;  %v1706_v34 = vpack.c.bf16 %v229_v27, %v225_v26  ;;  %v233_v38 = vld [vmem:[#allocation2 + $0x4d8] sm:$0xff] }
  0x7d   :  { %1683 = vmatprep.subr.bf16.mxu1 %v1682_v25  ;;  %v227_v25 = vld [vmem:[#allocation2 + $0x4a8] sm:$0xff]  ;;  %v1480_v28 = vpack.c.bf16 %v218_v20, %v214_v19  ;;  %v1704_v29 = vpack.c.bf16 %v220_v23, %v216_v21  ;;  %v237_v39 = vld [vmem:[#allocation2 + $0x4f8] sm:$0xff]  ;;  %v236_v47 = vld [vmem:[#allocation2 + $0x4f0] sm:$0xff] }
  0x7e   :  { %v1482_v30 = vpack.c.bf16 %v227_v25, %v223_v24  ;;  %v1710_v46 = vpack.c.bf16 %v237_v39, %v233_v38  ;;  %v239_v48 = vld [vmem:[#allocation2 + $0x508] sm:$0xff]  ;;  %v241_v50 = vld [vmem:[#allocation2 + $0x518] sm:$0xff]  ;;  %v244_v59 = vld [vmem:[#allocation2 + $0x530] sm:$0xff] }
  0x7f   :  { %1461 = vmatpush1.bf16.msra.mxu0 %v1460_v31  ;;  %v222_v31 = vld [vmem:[#allocation2 + $0x480] sm:$0xff]  ;;  %v245_v51 = vld [vmem:[#allocation2 + $0x538] sm:$0xff]  ;;  %v247_v60 = vld [vmem:[#allocation2 + $0x548] sm:$0xff] }
  0x80   :  { %1685 = vmatpush1.bf16.msra.mxu1 %v1684_v32  ;;  %1463 = vmatprep.subr.bf16.mxu0 %v1462_v33  ;;  %v226_v32 = vld [vmem:[#allocation2 + $0x4a0] sm:$0xff]  ;;  %v224_v33 = vld [vmem:[#allocation2 + $0x490] sm:$0xff]  ;;  %v1714_v58 = vpack.c.bf16 %v245_v51, %v241_v50  ;;  %v249_v62 = vld [vmem:[#allocation2 + $0x558] sm:$0xff] }
  0x81   :  { %1687 = vmatprep.subr.bf16.mxu1 %v1686_v37  ;;  %v235_v37 = vld [vmem:[#allocation2 + $0x4e8] sm:$0xff]  ;;  %v1484_v40 = vpack.c.bf16 %v226_v32, %v222_v31  ;;  %v1708_v41 = vpack.c.bf16 %v228_v35, %v224_v33  ;;  %v253_v63 = vld [vmem:[#allocation2 + $0x578] sm:$0xff]  ;;  %v252_v7 = vld [vmem:[#allocation2 + $0x570] sm:$0xff] }
  0x82   :  { %v1486_v42 = vpack.c.bf16 %v235_v37, %v231_v36  ;;  %v1718_v6 = vpack.c.bf16 %v253_v63, %v249_v62  ;;  %v255_v8 = vld [vmem:[#allocation2 + $0x588] sm:$0xff]  ;;  %v257_v10 = vld [vmem:[#allocation2 + $0x598] sm:$0xff]  ;;  %v254_v13 = vld [vmem:[#allocation2 + $0x580] sm:$0xff] }
  0x83   :  { %1465 = vmatpush1.bf16.msra.mxu0 %v1464_v43  ;;  %v230_v43 = vld [vmem:[#allocation2 + $0x4c0] sm:$0xff]  ;;  %v261_v11 = vld [vmem:[#allocation2 + $0x5b8] sm:$0xff]  ;;  %v263_v20 = vld [vmem:[#allocation2 + $0x5c8] sm:$0xff] }
  0x84   :  { %1689 = vmatpush1.bf16.msra.mxu1 %v1688_v44  ;;  %1467 = vmatprep.subr.bf16.mxu0 %v1466_v45  ;;  %v234_v44 = vld [vmem:[#allocation2 + $0x4e0] sm:$0xff]  ;;  %v232_v45 = vld [vmem:[#allocation2 + $0x4d0] sm:$0xff]  ;;  %v1722_v19 = vpack.c.bf16 %v261_v11, %v257_v10  ;;  %v267_v21 = vld [vmem:[#allocation2 + $0x5e8] sm:$0xff] }
  0x85   :  { %1691 = vmatprep.subr.bf16.mxu1 %v1690_v49  ;;  %v243_v49 = vld [vmem:[#allocation2 + $0x528] sm:$0xff]  ;;  %v1488_v52 = vpack.c.bf16 %v234_v44, %v230_v43  ;;  %v1712_v53 = vpack.c.bf16 %v236_v47, %v232_v45  ;;  %v265_v23 = vld [vmem:[#allocation2 + $0x5d8] sm:$0xff]  ;;  %v1502_v27 = vpack.c.bf16 %v267_v21, %v263_v20  ;;  %v268_v32 = vld [vmem:[#allocation2 + $0x5f0] sm:$0xff] }
  0x86   :  { %v1490_v54 = vpack.c.bf16 %v243_v49, %v239_v48  ;;  %v269_v24 = vld [vmem:[#allocation2 + $0x5f8] sm:$0xff]  ;;  %v271_v33 = vld [vmem:[#allocation2 + $0x608] sm:$0xff]  ;;  %v276_v44 = vld [vmem:[#allocation2 + $0x630] sm:$0xff] }
  0x87   :  { %1469 = vmatpush1.bf16.msra.mxu0 %v1468_v55  ;;  %v238_v55 = vld [vmem:[#allocation2 + $0x500] sm:$0xff]  ;;  %v1726_v31 = vpack.c.bf16 %v269_v24, %v265_v23  ;;  %v273_v35 = vld [vmem:[#allocation2 + $0x618] sm:$0xff]  ;;  %v279_v45 = vld [vmem:[#allocation2 + $0x648] sm:$0xff] }
  0x88   :  { %1693 = vmatpush1.bf16.msra.mxu1 %v1692_v56  ;;  %1471 = vmatprep.subr.bf16.mxu0 %v1470_v57  ;;  %v242_v56 = vld [vmem:[#allocation2 + $0x520] sm:$0xff]  ;;  %v240_v57 = vld [vmem:[#allocation2 + $0x510] sm:$0xff]  ;;  %v277_v36 = vld [vmem:[#allocation2 + $0x638] sm:$0xff] }
  0x89   :  { %1695 = vmatprep.subr.bf16.mxu1 %v1694_v61  ;;  %v251_v61 = vld [vmem:[#allocation2 + $0x568] sm:$0xff]  ;;  %v1492_v0 = vpack.c.bf16 %v242_v56, %v238_v55  ;;  %v1716_v1 = vpack.c.bf16 %v244_v59, %v240_v57  ;;  %v1730_v43 = vpack.c.bf16 %v277_v36, %v273_v35  ;;  %v281_v47 = vld [vmem:[#allocation2 + $0x658] sm:$0xff]  ;;  %v284_v56 = vld [vmem:[#allocation2 + $0x670] sm:$0xff] }
  0x8a   :  { %v1494_v2 = vpack.c.bf16 %v251_v61, %v247_v60  ;;  %v285_v48 = vld [vmem:[#allocation2 + $0x678] sm:$0xff]  ;;  %v287_v57 = vld [vmem:[#allocation2 + $0x688] sm:$0xff]  ;;  %v302_v24 = vld [vmem:[#allocation2 + $0x700] sm:$0xff] }
  0x8b   :  { %1473 = vmatpush1.bf16.msra.mxu0 %v1472_v3  ;;  %v246_v3 = vld [vmem:[#allocation2 + $0x540] sm:$0xff]  ;;  %v1734_v55 = vpack.c.bf16 %v285_v48, %v281_v47  ;;  %v289_v59 = vld [vmem:[#allocation2 + $0x698] sm:$0xff] }
  0x8c   :  { %1697 = vmatpush1.bf16.msra.mxu1 %v1696_v4  ;;  %1475 = vmatprep.subr.bf16.mxu0 %v1474_v5  ;;  %v250_v4 = vld [vmem:[#allocation2 + $0x560] sm:$0xff]  ;;  %v248_v5 = vld [vmem:[#allocation2 + $0x550] sm:$0xff]  ;;  %v293_v60 = vld [vmem:[#allocation2 + $0x6b8] sm:$0xff] }
  0x8d   :  { %1699 = vmatprep.subr.bf16.mxu1 %v1698_v9  ;;  %v259_v9 = vld [vmem:[#allocation2 + $0x5a8] sm:$0xff]  ;;  %v1496_v12 = vpack.c.bf16 %v250_v4, %v246_v3  ;;  %v1720_v14 = vpack.c.bf16 %v252_v7, %v248_v5  ;;  %v1738_v3 = vpack.c.bf16 %v293_v60, %v289_v59  ;;  %v292_v4 = vld [vmem:[#allocation2 + $0x6b0] sm:$0xff]  ;;  %v297_v7 = vld [vmem:[#allocation2 + $0x6d8] sm:$0xff] }
  0x8e   :  { %613 = vmatmul.mubr.f32.vlgmr.msra.gmra.mrb[0].mxu0 %v71_v15  ;;  %v295_v5 = vld [vmem:[#allocation2 + $0x6c8] sm:$0xff]  ;;  %v309_v20 = vld [vmem:[#allocation2 + $0x738] sm:$0xff]  ;;  %v310_v36 = vld [vmem:[#allocation2 + $0x740] sm:$0xff] }
  0x8f   :  { %1477 = vmatpush1.bf16.msra.mxu0 %v1476_v16  ;;  %897 = vmatmul.mubr.f32.vlgmr.msra.gmra.mrb[0].mxu1 %v71_v15  ;;  %v1498_v15 = vpack.c.bf16 %v259_v9, %v255_v8  ;;  %v258_v16 = vld [vmem:[#allocation2 + $0x5a0] sm:$0xff]  ;;  %v301_v8 = vld [vmem:[#allocation2 + $0x6f8] sm:$0xff] }
  0x90   :  { %1701 = vmatpush1.bf16.msra.mxu1 %v1700_v17  ;;  %1479 = vmatprep.subr.bf16.mxu0 %v1478_v18  ;;  %v256_v17 = vld [vmem:[#allocation2 + $0x590] sm:$0xff]  ;;  %v1500_v25 = vpack.c.bf16 %v258_v16, %v254_v13  ;;  %v298_v13 = vld [vmem:[#allocation2 + $0x6e0] sm:$0xff] }
  0x91   :  { %1703 = vmatprep.subr.bf16.mxu1 %v1702_v22  ;;  %v260_v18 = vld [vmem:[#allocation2 + $0x5b0] sm:$0xff]  ;;  %v74_v22 = vld [vmem:[%s2159_s0 + $0x18] sm:$0xff]  ;;  %v318_v48 = vld [vmem:[#allocation2 + $0x780] sm:$0xff] }
  0x92   :  { %683 = vmatprep.mubr.f32.mxu0 %v74_v22  ;;  %967 = vmatprep.mubr.f32.mxu1 %v74_v22  ;;  %v1724_v26 = vpack.c.bf16 %v260_v18, %v256_v17  ;;  %v300_v16 = vld [vmem:[#allocation2 + $0x6f0] sm:$0xff]  ;;  %v303_v17 = vld [vmem:[#allocation2 + $0x708] sm:$0xff]  ;;  %v326_v60 = vld [vmem:[#allocation2 + $0x7c0] sm:$0xff] }
  0x93   :  { %1481 = vmatpush1.bf16.msra.mxu0 %v1480_v28  ;;  %v262_v28 = vld [vmem:[#allocation2 + $0x5c0] sm:$0xff]  ;;  %v307_v18 = vld [vmem:[#allocation2 + $0x728] sm:$0xff] }
  0x94   :  { %1705 = vmatpush1.bf16.msra.mxu1 %v1704_v29  ;;  %1483 = vmatprep.subr.bf16.mxu0 %v1482_v30  ;;  %v266_v29 = vld [vmem:[#allocation2 + $0x5e0] sm:$0xff]  ;;  %v264_v30 = vld [vmem:[#allocation2 + $0x5d0] sm:$0xff]  ;;  %v1522_v23 = vpack.c.bf16 %v307_v18, %v303_v17 }
  0x95   :  { %1707 = vmatprep.subr.bf16.mxu1 %v1706_v34  ;;  %v275_v34 = vld [vmem:[#allocation2 + $0x628] sm:$0xff]  ;;  %v1504_v37 = vpack.c.bf16 %v266_v29, %v262_v28  ;;  %v1728_v38 = vpack.c.bf16 %v268_v32, %v264_v30  ;;  %v308_v28 = vld [vmem:[#allocation2 + $0x730] sm:$0xff]  ;;  %v317_v32 = vld [vmem:[#allocation2 + $0x778] sm:$0xff] }
  0x96   :  { %v1506_v39 = vpack.c.bf16 %v275_v34, %v271_v33  ;;  %v311_v29 = vld [vmem:[#allocation2 + $0x748] sm:$0xff]  ;;  %v73_v17 = vld [vmem:[%s2159_s0 + $0x10] sm:$0xff] }
  0x97   :  { %1485 = vmatpush1.bf16.msra.mxu0 %v1484_v40  ;;  %v270_v40 = vld [vmem:[#allocation2 + $0x600] sm:$0xff]  ;;  %v315_v30 = vld [vmem:[#allocation2 + $0x768] sm:$0xff] }
  0x98   :  { %1709 = vmatpush1.bf16.msra.mxu1 %v1708_v41  ;;  %1487 = vmatprep.subr.bf16.mxu0 %v1486_v42  ;;  %v274_v41 = vld [vmem:[#allocation2 + $0x620] sm:$0xff]  ;;  %v272_v42 = vld [vmem:[#allocation2 + $0x610] sm:$0xff]  ;;  %v1526_v35 = vpack.c.bf16 %v315_v30, %v311_v29  ;;  %v357_v29 = vld [vmem:[#allocation2 + $0x8b8] sm:$0xff] }
  0x99   :  { %1711 = vmatprep.subr.bf16.mxu1 %v1710_v46  ;;  %v283_v46 = vld [vmem:[#allocation2 + $0x668] sm:$0xff]  ;;  %v1508_v49 = vpack.c.bf16 %v274_v41, %v270_v40  ;;  %v1732_v50 = vpack.c.bf16 %v276_v44, %v272_v42  ;;  %v316_v40 = vld [vmem:[#allocation2 + $0x770] sm:$0xff]  ;;  %v325_v44 = vld [vmem:[#allocation2 + $0x7b8] sm:$0xff] }
  0x9a   :  { %v1510_v51 = vpack.c.bf16 %v283_v46, %v279_v45  ;;  %v319_v41 = vld [vmem:[#allocation2 + $0x788] sm:$0xff] }
  0x9b   :  { %1489 = vmatpush1.bf16.msra.mxu0 %v1488_v52  ;;  %v278_v52 = vld [vmem:[#allocation2 + $0x640] sm:$0xff]  ;;  %v323_v42 = vld [vmem:[#allocation2 + $0x7a8] sm:$0xff] }
  0x9c   :  { %1713 = vmatpush1.bf16.msra.mxu1 %v1712_v53  ;;  %1491 = vmatprep.subr.bf16.mxu0 %v1490_v54  ;;  %v282_v53 = vld [vmem:[#allocation2 + $0x660] sm:$0xff]  ;;  %v280_v54 = vld [vmem:[#allocation2 + $0x650] sm:$0xff]  ;;  %v1530_v47 = vpack.c.bf16 %v323_v42, %v319_v41  ;;  %v76_v30 = vld [vmem:[%s2159_s0 + $0x28] sm:$0xff] }
  0x9d   :  { %1715 = vmatprep.subr.bf16.mxu1 %v1714_v58  ;;  %v291_v58 = vld [vmem:[#allocation2 + $0x6a8] sm:$0xff]  ;;  %v1512_v61 = vpack.c.bf16 %v282_v53, %v278_v52  ;;  %v1736_v62 = vpack.c.bf16 %v284_v56, %v280_v54  ;;  %v324_v52 = vld [vmem:[#allocation2 + $0x7b0] sm:$0xff]  ;;  %v333_v56 = vld [vmem:[#allocation2 + $0x7f8] sm:$0xff] }
  0x9e   :  { %v1514_v63 = vpack.c.bf16 %v291_v58, %v287_v57  ;;  %v327_v53 = vld [vmem:[#allocation2 + $0x7c8] sm:$0xff]  ;;  %v361_v41 = vld [vmem:[#allocation2 + $0x8d8] sm:$0xff] }
  0x9f   :  { %1493 = vmatpush1.bf16.msra.mxu0 %v1492_v0  ;;  %v286_v0 = vld [vmem:[#allocation2 + $0x680] sm:$0xff]  ;;  %v331_v54 = vld [vmem:[#allocation2 + $0x7e8] sm:$0xff]  ;;  %v365_v42 = vld [vmem:[#allocation2 + $0x8f8] sm:$0xff] }
  0xa0   :  { %1717 = vmatpush1.bf16.msra.mxu1 %v1716_v1  ;;  %1495 = vmatprep.subr.bf16.mxu0 %v1494_v2  ;;  %v290_v1 = vld [vmem:[#allocation2 + $0x6a0] sm:$0xff]  ;;  %v288_v2 = vld [vmem:[#allocation2 + $0x690] sm:$0xff]  ;;  %v1534_v59 = vpack.c.bf16 %v331_v54, %v327_v53  ;;  %v369_v53 = vld [vmem:[#allocation2 + $0x918] sm:$0xff] }
  0xa1   :  { %1719 = vmatprep.subr.bf16.mxu1 %v1718_v6  ;;  %v299_v6 = vld [vmem:[#allocation2 + $0x6e8] sm:$0xff]  ;;  %v1516_v9 = vpack.c.bf16 %v290_v1, %v286_v0  ;;  %v1740_v10 = vpack.c.bf16 %v292_v4, %v288_v2  ;;  %v332_v0 = vld [vmem:[#allocation2 + $0x7f0] sm:$0xff]  ;;  %v341_v4 = vld [vmem:[#allocation2 + $0x838] sm:$0xff] }
  0xa2   :  { %v1518_v11 = vpack.c.bf16 %v299_v6, %v295_v5  ;;  %v335_v1 = vld [vmem:[#allocation2 + $0x808] sm:$0xff]  ;;  %v373_v54 = vld [vmem:[#allocation2 + $0x938] sm:$0xff] }
  0xa3   :  { %1497 = vmatpush1.bf16.msra.mxu0 %v1496_v12  ;;  %v294_v12 = vld [vmem:[#allocation2 + $0x6c0] sm:$0xff]  ;;  %v339_v2 = vld [vmem:[#allocation2 + $0x828] sm:$0xff] }
  0xa4   :  { %1721 = vmatpush1.bf16.msra.mxu1 %v1720_v14  ;;  %1499 = vmatprep.subr.bf16.mxu0 %v1498_v15  ;;  %v296_v14 = vld [vmem:[#allocation2 + $0x6d0] sm:$0xff]  ;;  %v1742_v15 = vpack.c.bf16 %v301_v8, %v297_v7  ;;  %v1520_v21 = vpack.c.bf16 %v298_v13, %v294_v12  ;;  %v1538_v7 = vpack.c.bf16 %v339_v2, %v335_v1  ;;  %v334_v8 = vld [vmem:[#allocation2 + $0x800] sm:$0xff]  ;;  %v343_v13 = vld [vmem:[#allocation2 + $0x848] sm:$0xff] }
  0xa5   :  { %1723 = vmatprep.subr.bf16.mxu1 %v1722_v19  ;;  %v305_v19 = vld [vmem:[#allocation2 + $0x718] sm:$0xff]  ;;  %v1744_v22 = vpack.c.bf16 %v300_v16, %v296_v14  ;;  %v340_v12 = vld [vmem:[#allocation2 + $0x830] sm:$0xff]  ;;  %v347_v14 = vld [vmem:[#allocation2 + $0x868] sm:$0xff] }
  0xa6   :  { %v349_v16 = vld [vmem:[#allocation2 + $0x878] sm:$0xff] }
  0xa7   :  { %1501 = vmatpush1.bf16.msra.mxu0 %v1500_v25  ;;  %v306_v25 = vld [vmem:[#allocation2 + $0x720] sm:$0xff]  ;;  %v377_v1 = vld [vmem:[#allocation2 + $0x958] sm:$0xff] }
  0xa8   :  { %1725 = vmatpush1.bf16.msra.mxu1 %v1724_v26  ;;  %1503 = vmatprep.subr.bf16.mxu0 %v1502_v27  ;;  %v304_v26 = vld [vmem:[#allocation2 + $0x710] sm:$0xff]  ;;  %v1746_v27 = vpack.c.bf16 %v309_v20, %v305_v19  ;;  %v1524_v33 = vpack.c.bf16 %v306_v25, %v302_v24  ;;  %v1542_v20 = vpack.c.bf16 %v347_v14, %v343_v13  ;;  %v381_v2 = vld [vmem:[#allocation2 + $0x978] sm:$0xff] }
  0xa9   :  { %1727 = vmatprep.subr.bf16.mxu1 %v1726_v31  ;;  %v313_v31 = vld [vmem:[#allocation2 + $0x758] sm:$0xff]  ;;  %v1748_v34 = vpack.c.bf16 %v308_v28, %v304_v26  ;;  %v348_v25 = vld [vmem:[#allocation2 + $0x870] sm:$0xff]  ;;  %v351_v26 = vld [vmem:[#allocation2 + $0x888] sm:$0xff] }
  0xaa   :  { %v353_v28 = vld [vmem:[#allocation2 + $0x898] sm:$0xff] }
  0xab   :  { %1505 = vmatpush1.bf16.msra.mxu0 %v1504_v37  ;;  %v314_v37 = vld [vmem:[#allocation2 + $0x760] sm:$0xff]  ;;  %v385_v13 = vld [vmem:[#allocation2 + $0x998] sm:$0xff] }
  0xac   :  { %1729 = vmatpush1.bf16.msra.mxu1 %v1728_v38  ;;  %1507 = vmatprep.subr.bf16.mxu0 %v1506_v39  ;;  %v312_v38 = vld [vmem:[#allocation2 + $0x750] sm:$0xff]  ;;  %v1750_v39 = vpack.c.bf16 %v317_v32, %v313_v31  ;;  %v1528_v45 = vpack.c.bf16 %v314_v37, %v310_v36  ;;  %v1770_v37 = vpack.c.bf16 %v357_v29, %v353_v28  ;;  %v389_v14 = vld [vmem:[#allocation2 + $0x9b8] sm:$0xff] }
  0xad   :  { %1731 = vmatprep.subr.bf16.mxu1 %v1730_v43  ;;  %v321_v43 = vld [vmem:[#allocation2 + $0x798] sm:$0xff]  ;;  %v1752_v46 = vpack.c.bf16 %v316_v40, %v312_v38  ;;  %v352_v36 = vld [vmem:[#allocation2 + $0x890] sm:$0xff]  ;;  %v363_v40 = vld [vmem:[#allocation2 + $0x8e8] sm:$0xff] }
  0xae   :  { %v356_v38 = vld [vmem:[#allocation2 + $0x8b0] sm:$0xff] }
  0xaf   :  { %1509 = vmatpush1.bf16.msra.mxu0 %v1508_v49  ;;  %v322_v49 = vld [vmem:[#allocation2 + $0x7a0] sm:$0xff] }
  0xb0   :  { %1733 = vmatpush1.bf16.msra.mxu1 %v1732_v50  ;;  %1511 = vmatprep.subr.bf16.mxu0 %v1510_v51  ;;  %v320_v50 = vld [vmem:[#allocation2 + $0x790] sm:$0xff]  ;;  %v1754_v51 = vpack.c.bf16 %v325_v44, %v321_v43  ;;  %v1532_v57 = vpack.c.bf16 %v322_v49, %v318_v48  ;;  %v1772_v44 = vpack.c.bf16 %v356_v38, %v352_v36  ;;  %v403_v36 = vld [vmem:[#allocation2 + $0xa28] sm:$0xff]  ;;  %v405_v38 = vld [vmem:[#allocation2 + $0xa38] sm:$0xff] }
  0xb1   :  { %1735 = vmatprep.subr.bf16.mxu1 %v1734_v55  ;;  %v329_v55 = vld [vmem:[#allocation2 + $0x7d8] sm:$0xff]  ;;  %v1756_v58 = vpack.c.bf16 %v324_v52, %v320_v50  ;;  %v360_v48 = vld [vmem:[#allocation2 + $0x8d0] sm:$0xff]  ;;  %v1774_v49 = vpack.c.bf16 %v365_v42, %v361_v41  ;;  %v371_v52 = vld [vmem:[#allocation2 + $0x928] sm:$0xff] }
  0xb2   :  { %v364_v50 = vld [vmem:[#allocation2 + $0x8f0] sm:$0xff]  ;;  %v398_v42 = vld [vmem:[#allocation2 + $0xa00] sm:$0xff] }
  0xb3   :  { %1513 = vmatpush1.bf16.msra.mxu0 %v1512_v61  ;;  %v330_v61 = vld [vmem:[#allocation2 + $0x7e0] sm:$0xff] }
  0xb4   :  { %1737 = vmatpush1.bf16.msra.mxu1 %v1736_v62  ;;  %1515 = vmatprep.subr.bf16.mxu0 %v1514_v63  ;;  %v328_v62 = vld [vmem:[#allocation2 + $0x7d0] sm:$0xff]  ;;  %v1758_v63 = vpack.c.bf16 %v333_v56, %v329_v55  ;;  %v1536_v5 = vpack.c.bf16 %v330_v61, %v326_v60  ;;  %v1776_v56 = vpack.c.bf16 %v364_v50, %v360_v48  ;;  %v411_v48 = vld [vmem:[#allocation2 + $0xa68] sm:$0xff]  ;;  %v413_v50 = vld [vmem:[#allocation2 + $0xa78] sm:$0xff] }
  0xb5   :  { %1739 = vmatprep.subr.bf16.mxu1 %v1738_v3  ;;  %v337_v3 = vld [vmem:[#allocation2 + $0x818] sm:$0xff]  ;;  %v1760_v6 = vpack.c.bf16 %v332_v0, %v328_v62  ;;  %v368_v60 = vld [vmem:[#allocation2 + $0x910] sm:$0xff]  ;;  %v1778_v61 = vpack.c.bf16 %v373_v54, %v369_v53  ;;  %v379_v0 = vld [vmem:[#allocation2 + $0x968] sm:$0xff] }
  0xb6   :  { %v372_v62 = vld [vmem:[#allocation2 + $0x930] sm:$0xff]  ;;  %v406_v54 = vld [vmem:[#allocation2 + $0xa40] sm:$0xff] }
  0xb7   :  { %1517 = vmatpush1.bf16.msra.mxu0 %v1516_v9  ;;  %v338_v9 = vld [vmem:[#allocation2 + $0x820] sm:$0xff] }
  0xb8   :  { %1741 = vmatpush1.bf16.msra.mxu1 %v1740_v10  ;;  %1519 = vmatprep.subr.bf16.mxu0 %v1518_v11  ;;  %v336_v10 = vld [vmem:[#allocation2 + $0x810] sm:$0xff]  ;;  %v1762_v11 = vpack.c.bf16 %v341_v4, %v337_v3  ;;  %v1540_v18 = vpack.c.bf16 %v338_v9, %v334_v8  ;;  %v1780_v4 = vpack.c.bf16 %v372_v62, %v368_v60  ;;  %v419_v60 = vld [vmem:[#allocation2 + $0xaa8] sm:$0xff]  ;;  %v421_v62 = vld [vmem:[#allocation2 + $0xab8] sm:$0xff] }
  0xb9   :  { %1743 = vmatprep.subr.bf16.mxu1 %v1742_v15  ;;  %v345_v15 = vld [vmem:[#allocation2 + $0x858] sm:$0xff]  ;;  %v1764_v19 = vpack.c.bf16 %v340_v12, %v336_v10  ;;  %v376_v8 = vld [vmem:[#allocation2 + $0x950] sm:$0xff]  ;;  %v1782_v9 = vpack.c.bf16 %v381_v2, %v377_v1  ;;  %v387_v12 = vld [vmem:[#allocation2 + $0x9a8] sm:$0xff] }
  0xba   :  { %v1766_v24 = vpack.c.bf16 %v349_v16, %v345_v15  ;;  %v380_v10 = vld [vmem:[#allocation2 + $0x970] sm:$0xff]  ;;  %v414_v2 = vld [vmem:[#allocation2 + $0xa80] sm:$0xff] }
  0xbb   :  { %1521 = vmatpush1.bf16.msra.mxu0 %v1520_v21  ;;  %v342_v21 = vld [vmem:[#allocation2 + $0x840] sm:$0xff]  ;;  %v1784_v16 = vpack.c.bf16 %v380_v10, %v376_v8  ;;  %v427_v8 = vld [vmem:[#allocation2 + $0xae8] sm:$0xff]  ;;  %v429_v10 = vld [vmem:[#allocation2 + $0xaf8] sm:$0xff] }
  0xbc   :  { %1745 = vmatpush1.bf16.msra.mxu1 %v1744_v22  ;;  %1523 = vmatprep.subr.bf16.mxu0 %v1522_v23  ;;  %v346_v22 = vld [vmem:[#allocation2 + $0x860] sm:$0xff]  ;;  %v344_v23 = vld [vmem:[#allocation2 + $0x850] sm:$0xff] }
  0xbd   :  { %1747 = vmatprep.subr.bf16.mxu1 %v1746_v27  ;;  %v355_v27 = vld [vmem:[#allocation2 + $0x8a8] sm:$0xff]  ;;  %v1544_v31 = vpack.c.bf16 %v346_v22, %v342_v21  ;;  %v1768_v32 = vpack.c.bf16 %v348_v25, %v344_v23  ;;  %v1786_v21 = vpack.c.bf16 %v389_v14, %v385_v13  ;;  %v388_v22 = vld [vmem:[#allocation2 + $0x9b0] sm:$0xff]  ;;  %v393_v25 = vld [vmem:[#allocation2 + $0x9d8] sm:$0xff] }
  0xbe   :  { %v391_v23 = vld [vmem:[#allocation2 + $0x9c8] sm:$0xff]  ;;  %v422_v14 = vld [vmem:[#allocation2 + $0xac0] sm:$0xff] }
  0xbf   :  { %1525 = vmatpush1.bf16.msra.mxu0 %v1524_v33  ;;  %v1546_v33 = vpack.c.bf16 %v355_v27, %v351_v26  ;;  %v397_v26 = vld [vmem:[#allocation2 + $0x9f8] sm:$0xff] }
  0xc0   :  { %1749 = vmatpush1.bf16.msra.mxu1 %v1748_v34  ;;  %1527 = vmatprep.subr.bf16.mxu0 %v1526_v35  ;;  %v350_v34 = vld [vmem:[#allocation2 + $0x880] sm:$0xff] }
  0xc1   :  { %1751 = vmatprep.subr.bf16.mxu1 %v1750_v39  ;;  %v354_v35 = vld [vmem:[#allocation2 + $0x8a0] sm:$0xff]  ;;  %v359_v39 = vld [vmem:[#allocation2 + $0x8c8] sm:$0xff] }
  0xc2   :  { %v1548_v43 = vpack.c.bf16 %v354_v35, %v350_v34  ;;  %v396_v34 = vld [vmem:[#allocation2 + $0x9f0] sm:$0xff]  ;;  %v399_v35 = vld [vmem:[#allocation2 + $0xa08] sm:$0xff] }
  0xc3   :  { %1529 = vmatpush1.bf16.msra.mxu0 %v1528_v45  ;;  %v1550_v45 = vpack.c.bf16 %v363_v40, %v359_v39  ;;  %v1570_v41 = vpack.c.bf16 %v403_v36, %v399_v35 }
  0xc4   :  { %1753 = vmatpush1.bf16.msra.mxu1 %v1752_v46  ;;  %1531 = vmatprep.subr.bf16.mxu0 %v1530_v47  ;;  %v358_v46 = vld [vmem:[#allocation2 + $0x8c0] sm:$0xff] }
  0xc5   :  { %1755 = vmatprep.subr.bf16.mxu1 %v1754_v51  ;;  %v362_v47 = vld [vmem:[#allocation2 + $0x8e0] sm:$0xff]  ;;  %v367_v51 = vld [vmem:[#allocation2 + $0x908] sm:$0xff] }
  0xc6   :  { %v1552_v55 = vpack.c.bf16 %v362_v47, %v358_v46  ;;  %v404_v46 = vld [vmem:[#allocation2 + $0xa30] sm:$0xff]  ;;  %v407_v47 = vld [vmem:[#allocation2 + $0xa48] sm:$0xff] }
  0xc7   :  { %1533 = vmatpush1.bf16.msra.mxu0 %v1532_v57  ;;  %v1554_v57 = vpack.c.bf16 %v371_v52, %v367_v51  ;;  %v1574_v53 = vpack.c.bf16 %v411_v48, %v407_v47 }
  0xc8   :  { %1757 = vmatpush1.bf16.msra.mxu1 %v1756_v58  ;;  %1535 = vmatprep.subr.bf16.mxu0 %v1534_v59  ;;  %v366_v58 = vld [vmem:[#allocation2 + $0x900] sm:$0xff] }
  0xc9   :  { %1759 = vmatprep.subr.bf16.mxu1 %v1758_v63  ;;  %v370_v59 = vld [vmem:[#allocation2 + $0x920] sm:$0xff]  ;;  %v375_v63 = vld [vmem:[#allocation2 + $0x948] sm:$0xff] }
  0xca   :  { %v1556_v3 = vpack.c.bf16 %v370_v59, %v366_v58  ;;  %v412_v58 = vld [vmem:[#allocation2 + $0xa70] sm:$0xff]  ;;  %v415_v59 = vld [vmem:[#allocation2 + $0xa88] sm:$0xff] }
  0xcb   :  { %1537 = vmatpush1.bf16.msra.mxu0 %v1536_v5  ;;  %v1558_v5 = vpack.c.bf16 %v379_v0, %v375_v63  ;;  %v1578_v1 = vpack.c.bf16 %v419_v60, %v415_v59 }
  0xcc   :  { %1761 = vmatpush1.bf16.msra.mxu1 %v1760_v6  ;;  %1539 = vmatprep.subr.bf16.mxu0 %v1538_v7  ;;  %v374_v6 = vld [vmem:[#allocation2 + $0x940] sm:$0xff] }
  0xcd   :  { %1763 = vmatprep.subr.bf16.mxu1 %v1762_v11  ;;  %v378_v7 = vld [vmem:[#allocation2 + $0x960] sm:$0xff]  ;;  %v383_v11 = vld [vmem:[#allocation2 + $0x988] sm:$0xff] }
  0xce   :  { %684 = vmatmul.mubr.f32.vlgmr.msra.gmra.mrb[0].mxu0 %v73_v17  ;;  %v1560_v15 = vpack.c.bf16 %v378_v7, %v374_v6  ;;  %v420_v6 = vld [vmem:[#allocation2 + $0xab0] sm:$0xff]  ;;  %v423_v7 = vld [vmem:[#allocation2 + $0xac8] sm:$0xff] }
  0xcf   :  { %1541 = vmatpush1.bf16.msra.mxu0 %v1540_v18  ;;  %968 = vmatmul.mubr.f32.vlgmr.msra.gmra.mrb[0].mxu1 %v73_v17  ;;  %v1562_v17 = vpack.c.bf16 %v387_v12, %v383_v11  ;;  %v382_v18 = vld [vmem:[#allocation2 + $0x980] sm:$0xff]  ;;  %v1582_v13 = vpack.c.bf16 %v427_v8, %v423_v7 }
  0xd0   :  { %1765 = vmatpush1.bf16.msra.mxu1 %v1764_v19  ;;  %1543 = vmatprep.subr.bf16.mxu0 %v1542_v20  ;;  %v386_v19 = vld [vmem:[#allocation2 + $0x9a0] sm:$0xff]  ;;  %v384_v20 = vld [vmem:[#allocation2 + $0x990] sm:$0xff] }
  0xd1   :  { %1767 = vmatprep.subr.bf16.mxu1 %v1766_v24  ;;  %754 = vmatprep.mubr.f32.mxu0 %v76_v30  ;;  %v395_v24 = vld [vmem:[#allocation2 + $0x9e8] sm:$0xff]  ;;  %v1564_v27 = vpack.c.bf16 %v386_v19, %v382_v18  ;;  %v1788_v28 = vpack.c.bf16 %v388_v22, %v384_v20  ;;  %v428_v18 = vld [vmem:[#allocation2 + $0xaf0] sm:$0xff]  ;;  %v437_v22 = vld [vmem:[#allocation2 + $0xb38] sm:$0xff] }
  0xd2   :  { %1038 = vmatprep.mubr.f32.mxu1 %v76_v30  ;;  %v1566_v29 = vpack.c.bf16 %v395_v24, %v391_v23  ;;  %v390_v30 = vld [vmem:[#allocation2 + $0x9c0] sm:$0xff]  ;;  %v431_v19 = vld [vmem:[#allocation2 + $0xb08] sm:$0xff] }
  0xd3   :  { %1545 = vmatpush1.bf16.msra.mxu0 %v1544_v31  ;;  %v394_v31 = vld [vmem:[#allocation2 + $0x9e0] sm:$0xff]  ;;  %v435_v20 = vld [vmem:[#allocation2 + $0xb28] sm:$0xff] }
  0xd4   :  { %1769 = vmatpush1.bf16.msra.mxu1 %v1768_v32  ;;  %1547 = vmatprep.subr.bf16.mxu0 %v1546_v33  ;;  %v392_v32 = vld [vmem:[#allocation2 + $0x9d0] sm:$0xff]  ;;  %v1790_v33 = vpack.c.bf16 %v397_v26, %v393_v25  ;;  %v1568_v39 = vpack.c.bf16 %v394_v31, %v390_v30  ;;  %v1586_v25 = vpack.c.bf16 %v435_v20, %v431_v19  ;;  %v430_v26 = vld [vmem:[#allocation2 + $0xb00] sm:$0xff]  ;;  %v439_v31 = vld [vmem:[#allocation2 + $0xb48] sm:$0xff] }
  0xd5   :  { %1771 = vmatprep.subr.bf16.mxu1 %v1770_v37  ;;  %v401_v37 = vld [vmem:[#allocation2 + $0xa18] sm:$0xff]  ;;  %v1792_v40 = vpack.c.bf16 %v396_v34, %v392_v32  ;;  %v436_v30 = vld [vmem:[#allocation2 + $0xb30] sm:$0xff]  ;;  %v443_v32 = vld [vmem:[#allocation2 + $0xb68] sm:$0xff] }
  0xd6   :  { %v445_v34 = vld [vmem:[#allocation2 + $0xb78] sm:$0xff]  ;;  %v75_v19 = vld [vmem:[%s2159_s0 + $0x20] sm:$0xff] }
  0xd7   :  { %1549 = vmatpush1.bf16.msra.mxu0 %v1548_v43  ;;  %v402_v43 = vld [vmem:[#allocation2 + $0xa20] sm:$0xff] }
  0xd8   :  { %1773 = vmatpush1.bf16.msra.mxu1 %v1772_v44  ;;  %1551 = vmatprep.subr.bf16.mxu0 %v1550_v45  ;;  %v400_v44 = vld [vmem:[#allocation2 + $0xa10] sm:$0xff]  ;;  %v1794_v45 = vpack.c.bf16 %v405_v38, %v401_v37  ;;  %v1572_v51 = vpack.c.bf16 %v402_v43, %v398_v42  ;;  %v1590_v37 = vpack.c.bf16 %v443_v32, %v439_v31  ;;  %v438_v38 = vld [vmem:[#allocation2 + $0xb40] sm:$0xff]  ;;  %v447_v43 = vld [vmem:[#allocation2 + $0xb88] sm:$0xff] }
  0xd9   :  { %1775 = vmatprep.subr.bf16.mxu1 %v1774_v49  ;;  %v409_v49 = vld [vmem:[#allocation2 + $0xa58] sm:$0xff]  ;;  %v1796_v52 = vpack.c.bf16 %v404_v46, %v400_v44  ;;  %v444_v42 = vld [vmem:[#allocation2 + $0xb70] sm:$0xff]  ;;  %v451_v44 = vld [vmem:[#allocation2 + $0xba8] sm:$0xff] }
  0xda   :  { %v453_v46 = vld [vmem:[#allocation2 + $0xbb8] sm:$0xff] }
  0xdb   :  { %1553 = vmatpush1.bf16.msra.mxu0 %v1552_v55  ;;  %v410_v55 = vld [vmem:[#allocation2 + $0xa60] sm:$0xff]  ;;  %v485_v31 = vld [vmem:[#allocation2 + $0xcb8] sm:$0xff] }
  0xdc   :  { %1777 = vmatpush1.bf16.msra.mxu1 %v1776_v56  ;;  %1555 = vmatprep.subr.bf16.mxu0 %v1554_v57  ;;  %v408_v56 = vld [vmem:[#allocation2 + $0xa50] sm:$0xff]  ;;  %v1798_v57 = vpack.c.bf16 %v413_v50, %v409_v49  ;;  %v1576_v63 = vpack.c.bf16 %v410_v55, %v406_v54  ;;  %v1594_v49 = vpack.c.bf16 %v451_v44, %v447_v43  ;;  %v446_v50 = vld [vmem:[#allocation2 + $0xb80] sm:$0xff]  ;;  %v455_v55 = vld [vmem:[#allocation2 + $0xbc8] sm:$0xff] }
  0xdd   :  { %1779 = vmatprep.subr.bf16.mxu1 %v1778_v61  ;;  %v417_v61 = vld [vmem:[#allocation2 + $0xa98] sm:$0xff]  ;;  %v1800_v0 = vpack.c.bf16 %v412_v58, %v408_v56  ;;  %v452_v54 = vld [vmem:[#allocation2 + $0xbb0] sm:$0xff]  ;;  %v459_v56 = vld [vmem:[#allocation2 + $0xbe8] sm:$0xff] }
  0xde   :  { %v461_v58 = vld [vmem:[#allocation2 + $0xbf8] sm:$0xff] }
  0xdf   :  { %1557 = vmatpush1.bf16.msra.mxu0 %v1556_v3  ;;  %v418_v3 = vld [vmem:[#allocation2 + $0xaa0] sm:$0xff]  ;;  %v489_v43 = vld [vmem:[#allocation2 + $0xcd8] sm:$0xff] }
  0xe0   :  { %1781 = vmatpush1.bf16.msra.mxu1 %v1780_v4  ;;  %1559 = vmatprep.subr.bf16.mxu0 %v1558_v5  ;;  %v416_v4 = vld [vmem:[#allocation2 + $0xa90] sm:$0xff]  ;;  %v1802_v5 = vpack.c.bf16 %v421_v62, %v417_v61  ;;  %v1580_v11 = vpack.c.bf16 %v418_v3, %v414_v2  ;;  %v1598_v61 = vpack.c.bf16 %v459_v56, %v455_v55  ;;  %v454_v62 = vld [vmem:[#allocation2 + $0xbc0] sm:$0xff]  ;;  %v463_v3 = vld [vmem:[#allocation2 + $0xc08] sm:$0xff] }
  0xe1   :  { %1783 = vmatprep.subr.bf16.mxu1 %v1782_v9  ;;  %v425_v9 = vld [vmem:[#allocation2 + $0xad8] sm:$0xff]  ;;  %v1804_v12 = vpack.c.bf16 %v420_v6, %v416_v4  ;;  %v460_v2 = vld [vmem:[#allocation2 + $0xbf0] sm:$0xff]  ;;  %v467_v4 = vld [vmem:[#allocation2 + $0xc28] sm:$0xff] }
  0xe2   :  { %v469_v6 = vld [vmem:[#allocation2 + $0xc38] sm:$0xff] }
  0xe3   :  { %1561 = vmatpush1.bf16.msra.mxu0 %v1560_v15  ;;  %v426_v15 = vld [vmem:[#allocation2 + $0xae0] sm:$0xff]  ;;  %v493_v44 = vld [vmem:[#allocation2 + $0xcf8] sm:$0xff] }
  0xe4   :  { %1785 = vmatpush1.bf16.msra.mxu1 %v1784_v16  ;;  %1563 = vmatprep.subr.bf16.mxu0 %v1562_v17  ;;  %v424_v16 = vld [vmem:[#allocation2 + $0xad0] sm:$0xff]  ;;  %v1806_v17 = vpack.c.bf16 %v429_v10, %v425_v9  ;;  %v1584_v23 = vpack.c.bf16 %v426_v15, %v422_v14  ;;  %v1602_v9 = vpack.c.bf16 %v467_v4, %v463_v3  ;;  %v462_v10 = vld [vmem:[#allocation2 + $0xc00] sm:$0xff]  ;;  %v471_v15 = vld [vmem:[#allocation2 + $0xc48] sm:$0xff] }
  0xe5   :  { %1787 = vmatprep.subr.bf16.mxu1 %v1786_v21  ;;  %v433_v21 = vld [vmem:[#allocation2 + $0xb18] sm:$0xff]  ;;  %v1808_v24 = vpack.c.bf16 %v428_v18, %v424_v16  ;;  %v468_v14 = vld [vmem:[#allocation2 + $0xc30] sm:$0xff]  ;;  %v475_v16 = vld [vmem:[#allocation2 + $0xc68] sm:$0xff] }
  0xe6   :  { %v477_v18 = vld [vmem:[#allocation2 + $0xc78] sm:$0xff] }
  0xe7   :  { %1565 = vmatpush1.bf16.msra.mxu0 %v1564_v27  ;;  %v434_v27 = vld [vmem:[#allocation2 + $0xb20] sm:$0xff]  ;;  %v497_v55 = vld [vmem:[#allocation2 + $0xd18] sm:$0xff] }
  0xe8   :  { %1789 = vmatpush1.bf16.msra.mxu1 %v1788_v28  ;;  %1567 = vmatprep.subr.bf16.mxu0 %v1566_v29  ;;  %v432_v28 = vld [vmem:[#allocation2 + $0xb10] sm:$0xff]  ;;  %v1810_v29 = vpack.c.bf16 %v437_v22, %v433_v21  ;;  %v1588_v35 = vpack.c.bf16 %v434_v27, %v430_v26  ;;  %v1606_v22 = vpack.c.bf16 %v475_v16, %v471_v15  ;;  %v501_v56 = vld [vmem:[#allocation2 + $0xd38] sm:$0xff] }
  0xe9   :  { %1791 = vmatprep.subr.bf16.mxu1 %v1790_v33  ;;  %v441_v33 = vld [vmem:[#allocation2 + $0xb58] sm:$0xff]  ;;  %v1812_v36 = vpack.c.bf16 %v436_v30, %v432_v28  ;;  %v476_v27 = vld [vmem:[#allocation2 + $0xc70] sm:$0xff]  ;;  %v479_v28 = vld [vmem:[#allocation2 + $0xc88] sm:$0xff] }
  0xea   :  { %v481_v30 = vld [vmem:[#allocation2 + $0xc98] sm:$0xff] }
  0xeb   :  { %1569 = vmatpush1.bf16.msra.mxu0 %v1568_v39  ;;  %v442_v39 = vld [vmem:[#allocation2 + $0xb60] sm:$0xff]  ;;  %v505_v3 = vld [vmem:[#allocation2 + $0xd58] sm:$0xff] }
  0xec   :  { %1793 = vmatpush1.bf16.msra.mxu1 %v1792_v40  ;;  %1571 = vmatprep.subr.bf16.mxu0 %v1570_v41  ;;  %v440_v40 = vld [vmem:[#allocation2 + $0xb50] sm:$0xff]  ;;  %v1814_v41 = vpack.c.bf16 %v445_v34, %v441_v33  ;;  %v1592_v47 = vpack.c.bf16 %v442_v39, %v438_v38  ;;  %v1834_v38 = vpack.c.bf16 %v485_v31, %v481_v30  ;;  %v509_v4 = vld [vmem:[#allocation2 + $0xd78] sm:$0xff] }
  0xed   :  { %1795 = vmatprep.subr.bf16.mxu1 %v1794_v45  ;;  %v449_v45 = vld [vmem:[#allocation2 + $0xb98] sm:$0xff]  ;;  %v1816_v48 = vpack.c.bf16 %v444_v42, %v440_v40  ;;  %v484_v39 = vld [vmem:[#allocation2 + $0xcb0] sm:$0xff]  ;;  %v487_v40 = vld [vmem:[#allocation2 + $0xcc8] sm:$0xff]  ;;  %v2049_v42 = vmov 0.0  }
  0xee   :  { %v513_v15 = vld [vmem:[#allocation2 + $0xd98] sm:$0xff] }
  0xef   :  { %1573 = vmatpush1.bf16.msra.mxu0 %v1572_v51  ;;  %v450_v51 = vld [vmem:[#allocation2 + $0xba0] sm:$0xff]  ;;  %v517_v16 = vld [vmem:[#allocation2 + $0xdb8] sm:$0xff] }
  0xf0   :  { %1797 = vmatpush1.bf16.msra.mxu1 %v1796_v52  ;;  %1575 = vmatprep.subr.bf16.mxu0 %v1574_v53  ;;  %v448_v52 = vld [vmem:[#allocation2 + $0xb90] sm:$0xff]  ;;  %v1818_v53 = vpack.c.bf16 %v453_v46, %v449_v45  ;;  %v1596_v59 = vpack.c.bf16 %v450_v51, %v446_v50  ;;  %v1838_v51 = vpack.c.bf16 %v493_v44, %v489_v43  ;;  %v1120_v44 = vld [vmem:[#allocation6] sm:$0xff] }
  0xf1   :  { %1799 = vmatprep.subr.bf16.mxu1 %v1798_v57  ;;  %v457_v57 = vld [vmem:[#allocation2 + $0xbd8] sm:$0xff]  ;;  %v1820_v60 = vpack.c.bf16 %v452_v54, %v448_v52  ;;  %v488_v50 = vld [vmem:[#allocation2 + $0xcd0] sm:$0xff]  ;;  %v499_v54 = vld [vmem:[#allocation2 + $0xd28] sm:$0xff] }
  0xf2   :  { %v492_v52 = vld [vmem:[#allocation2 + $0xcf0] sm:$0xff] }
  0xf3   :  { %1577 = vmatpush1.bf16.msra.mxu0 %v1576_v63  ;;  %v458_v63 = vld [vmem:[#allocation2 + $0xbe0] sm:$0xff] }
  0xf4   :  { %1801 = vmatpush1.bf16.msra.mxu1 %v1800_v0  ;;  %1579 = vmatprep.subr.bf16.mxu0 %v1578_v1  ;;  %v456_v0 = vld [vmem:[#allocation2 + $0xbd0] sm:$0xff]  ;;  %v1822_v1 = vpack.c.bf16 %v461_v58, %v457_v57  ;;  %v1600_v7 = vpack.c.bf16 %v458_v63, %v454_v62  ;;  %v1840_v58 = vpack.c.bf16 %v492_v52, %v488_v50  ;;  %v1139_v50 = vld [vmem:[#allocation6 + $0x98] sm:$0xff] }
  0xf5   :  { %1803 = vmatprep.subr.bf16.mxu1 %v1802_v5  ;;  %v465_v5 = vld [vmem:[#allocation2 + $0xc18] sm:$0xff]  ;;  %v1824_v8 = vpack.c.bf16 %v460_v2, %v456_v0  ;;  %v496_v62 = vld [vmem:[#allocation2 + $0xd10] sm:$0xff]  ;;  %v1842_v63 = vpack.c.bf16 %v501_v56, %v497_v55  ;;  %v507_v2 = vld [vmem:[#allocation2 + $0xd68] sm:$0xff] }
  0xf6   :  { %v500_v0 = vld [vmem:[#allocation2 + $0xd30] sm:$0xff]  ;;  %v1171_v52 = vld [vmem:[#allocation6 + $0x198] sm:$0xff] }
  0xf7   :  { %1581 = vmatpush1.bf16.msra.mxu0 %v1580_v11  ;;  %v466_v11 = vld [vmem:[#allocation2 + $0xc20] sm:$0xff] }
  0xf8   :  { %1805 = vmatpush1.bf16.msra.mxu1 %v1804_v12  ;;  %1583 = vmatprep.subr.bf16.mxu0 %v1582_v13  ;;  %v464_v12 = vld [vmem:[#allocation2 + $0xc10] sm:$0xff]  ;;  %v1826_v13 = vpack.c.bf16 %v469_v6, %v465_v5  ;;  %v1604_v20 = vpack.c.bf16 %v466_v11, %v462_v10  ;;  %v1844_v6 = vpack.c.bf16 %v500_v0, %v496_v62  ;;  %v1140_v62 = vld [vmem:[#allocation6 + $0xa0] sm:$0xff] }
  0xf9   :  { %1807 = vmatprep.subr.bf16.mxu1 %v1806_v17  ;;  %v473_v17 = vld [vmem:[#allocation2 + $0xc58] sm:$0xff]  ;;  %v1828_v21 = vpack.c.bf16 %v468_v14, %v464_v12  ;;  %v504_v10 = vld [vmem:[#allocation2 + $0xd50] sm:$0xff]  ;;  %v1846_v11 = vpack.c.bf16 %v509_v4, %v505_v3  ;;  %v515_v14 = vld [vmem:[#allocation2 + $0xda8] sm:$0xff] }
  0xfa   :  { %v1830_v26 = vpack.c.bf16 %v477_v18, %v473_v17  ;;  %v508_v12 = vld [vmem:[#allocation2 + $0xd70] sm:$0xff]  ;;  %v1172_v0 = vld [vmem:[#allocation6 + $0x1a0] sm:$0xff] }
  0xfb   :  { %1585 = vmatpush1.bf16.msra.mxu0 %v1584_v23  ;;  %v470_v23 = vld [vmem:[#allocation2 + $0xc40] sm:$0xff]  ;;  %v1848_v18 = vpack.c.bf16 %v508_v12, %v504_v10  ;;  %v1142_v10 = vld [vmem:[#allocation6 + $0xb0] sm:$0xff] }
  0xfc   :  { %1809 = vmatpush1.bf16.msra.mxu1 %v1808_v24  ;;  %1587 = vmatprep.subr.bf16.mxu0 %v1586_v25  ;;  %v474_v24 = vld [vmem:[#allocation2 + $0xc60] sm:$0xff]  ;;  %v472_v25 = vld [vmem:[#allocation2 + $0xc50] sm:$0xff] }
  0xfd   :  { %1811 = vmatprep.subr.bf16.mxu1 %v1810_v29  ;;  %v483_v29 = vld [vmem:[#allocation2 + $0xca8] sm:$0xff]  ;;  %v1608_v32 = vpack.c.bf16 %v474_v24, %v470_v23  ;;  %v1832_v33 = vpack.c.bf16 %v476_v27, %v472_v25  ;;  %v1850_v23 = vpack.c.bf16 %v517_v16, %v513_v15  ;;  %v516_v24 = vld [vmem:[#allocation2 + $0xdb0] sm:$0xff]  ;;  %v521_v27 = vld [vmem:[#allocation2 + $0xdd8] sm:$0xff] }
  0xfe   :  { %v1610_v34 = vpack.c.bf16 %v483_v29, %v479_v28  ;;  %v519_v25 = vld [vmem:[#allocation2 + $0xdc8] sm:$0xff]  ;;  %v525_v28 = vld [vmem:[#allocation2 + $0xdf8] sm:$0xff] }
  0xff   :  { %1589 = vmatpush1.bf16.msra.mxu0 %v1588_v35  ;;  %v478_v35 = vld [vmem:[#allocation2 + $0xc80] sm:$0xff]  ;;  %v1174_v12 = vld [vmem:[#allocation6 + $0x1b0] sm:$0xff] }
 0x100   :  { %1813 = vmatpush1.bf16.msra.mxu1 %v1812_v36  ;;  %1591 = vmatprep.subr.bf16.mxu0 %v1590_v37  ;;  %v482_v36 = vld [vmem:[#allocation2 + $0xca0] sm:$0xff]  ;;  %v480_v37 = vld [vmem:[#allocation2 + $0xc90] sm:$0xff] }
 0x101   :  { %1815 = vmatprep.subr.bf16.mxu1 %v1814_v41  ;;  %v491_v41 = vld [vmem:[#allocation2 + $0xce8] sm:$0xff]  ;;  %v1612_v45 = vpack.c.bf16 %v482_v36, %v478_v35  ;;  %v1836_v46 = vpack.c.bf16 %v484_v39, %v480_v37  ;;  %v1854_v35 = vpack.c.bf16 %v525_v28, %v521_v27  ;;  %v524_v36 = vld [vmem:[#allocation2 + $0xdf0] sm:$0xff] }
 0x102   :  { %v1136_v37 = vld [vmem:[#allocation6 + $0x80] sm:$0xff] }
 0x103   :  { %1593 = vmatpush1.bf16.msra.mxu0 %v1592_v47  ;;  %v1614_v47 = vpack.c.bf16 %v491_v41, %v487_v40  ;;  %v1168_v39 = vld [vmem:[#allocation6 + $0x180] sm:$0xff]  ;;  %v1169_v40 = vld [vmem:[#allocation6 + $0x188] sm:$0xff] }
 0x104   :  { %1817 = vmatpush1.bf16.msra.mxu1 %v1816_v48  ;;  %1595 = vmatprep.subr.bf16.mxu0 %v1594_v49  ;;  %v486_v48 = vld [vmem:[#allocation2 + $0xcc0] sm:$0xff] }
 0x105   :  { %1819 = vmatprep.subr.bf16.mxu1 %v1818_v53  ;;  %v490_v49 = vld [vmem:[#allocation2 + $0xce0] sm:$0xff]  ;;  %v495_v53 = vld [vmem:[#allocation2 + $0xd08] sm:$0xff] }
 0x106   :  { %v1616_v57 = vpack.c.bf16 %v490_v49, %v486_v48  ;;  %v1153_v48 = vld [vmem:[#allocation6 + $0x108] sm:$0xff]  ;;  %v1138_v49 = vld [vmem:[#allocation6 + $0x90] sm:$0xff] }
 0x107   :  { %1597 = vmatpush1.bf16.msra.mxu0 %v1596_v59  ;;  %v1618_v59 = vpack.c.bf16 %v499_v54, %v495_v53  ;;  %v77_v53 = vld [vmem:[%s2159_s0 + $0x30] sm:$0xff]  ;;  %v1862_v56 = vpack.c.bf16 %v1139_v50, %v1138_v49 }
 0x108   :  { %1821 = vmatpush1.bf16.msra.mxu1 %v1820_v60  ;;  %1599 = vmatprep.subr.bf16.mxu0 %v1598_v61  ;;  %v494_v60 = vld [vmem:[#allocation2 + $0xd00] sm:$0xff]  ;;  %v1181_v49 = vld [vmem:[#allocation6 + $0x1e8] sm:$0xff] }
 0x109   :  { %1823 = vmatprep.subr.bf16.mxu1 %v1822_v1  ;;  %v498_v61 = vld [vmem:[#allocation2 + $0xd20] sm:$0xff]  ;;  %v503_v1 = vld [vmem:[#allocation2 + $0xd48] sm:$0xff] }
 0x10a   :  { %v1620_v5 = vpack.c.bf16 %v498_v61, %v494_v60  ;;  %v1155_v61 = vld [vmem:[#allocation6 + $0x118] sm:$0xff] }
 0x10b   :  { %1601 = vmatpush1.bf16.msra.mxu0 %v1600_v7  ;;  %v1622_v7 = vpack.c.bf16 %v507_v2, %v503_v1  ;;  %v1173_v1 = vld [vmem:[#allocation6 + $0x1a8] sm:$0xff] }
 0x10c   :  { %1825 = vmatpush1.bf16.msra.mxu1 %v1824_v8  ;;  %1603 = vmatprep.subr.bf16.mxu0 %v1602_v9  ;;  %v502_v8 = vld [vmem:[#allocation2 + $0xd40] sm:$0xff] }
 0x10d   :  { %1827 = vmatprep.subr.bf16.mxu1 %v1826_v13  ;;  %v506_v9 = vld [vmem:[#allocation2 + $0xd60] sm:$0xff]  ;;  %v511_v13 = vld [vmem:[#allocation2 + $0xd88] sm:$0xff] }
 0x10e   :  { %755 = vmatmul.mubr.f32.vlgmr.msra.gmra.mrb[0].mxu0 %v75_v19  ;;  %v1624_v17 = vpack.c.bf16 %v506_v9, %v502_v8  ;;  %v1898_v8 = vpack.c.bf16 %v1173_v1, %v1172_v0  ;;  %v1157_v9 = vld [vmem:[#allocation6 + $0x128] sm:$0xff]  ;;  %v1183_v0 = vld [vmem:[#allocation6 + $0x1f8] sm:$0xff]  ;;  %v1134_v1 = vld [vmem:[#allocation6 + $0x70] sm:$0xff] }
 0x10f   :  { %1605 = vmatpush1.bf16.msra.mxu0 %v1604_v20  ;;  %1039 = vmatmul.mubr.f32.vlgmr.msra.gmra.mrb[0].mxu1 %v75_v19  ;;  %v1626_v19 = vpack.c.bf16 %v515_v14, %v511_v13  ;;  %v510_v20 = vld [vmem:[#allocation2 + $0xd80] sm:$0xff] }
 0x110   :  { %1829 = vmatpush1.bf16.msra.mxu1 %v1828_v21  ;;  %1607 = vmatprep.subr.bf16.mxu0 %v1606_v22  ;;  %v514_v21 = vld [vmem:[#allocation2 + $0xda0] sm:$0xff]  ;;  %v512_v22 = vld [vmem:[#allocation2 + $0xd90] sm:$0xff] }
 0x111   :  { %1831 = vmatprep.subr.bf16.mxu1 %v1830_v26  ;;  %825 = vmatprep.mubr.f32.mxu0 %v2049_v42  ;;  %v523_v26 = vld [vmem:[#allocation2 + $0xde8] sm:$0xff]  ;;  %v1628_v29 = vpack.c.bf16 %v514_v21, %v510_v20  ;;  %v1852_v30 = vpack.c.bf16 %v516_v24, %v512_v22  ;;  %v1175_v13 = vld [vmem:[#allocation6 + $0x1b8] sm:$0xff] }
 0x112   :  { %1109 = vmatprep.mubr.f32.mxu1 %v2049_v42  ;;  %v1630_v31 = vpack.c.bf16 %v523_v26, %v519_v25  ;;  %v1902_v20 = vpack.c.bf16 %v1175_v13, %v1174_v12  ;;  %v1159_v21 = vld [vmem:[#allocation6 + $0x138] sm:$0xff]  ;;  %v1144_v22 = vld [vmem:[#allocation6 + $0xc0] sm:$0xff]  ;;  %v1177_v25 = vld [vmem:[#allocation6 + $0x1c8] sm:$0xff] }
 0x113   :  { %1609 = vmatpush1.bf16.msra.mxu0 %v1608_v32  ;;  %v518_v32 = vld [vmem:[#allocation2 + $0xdc0] sm:$0xff] }
 0x114   :  { %1833 = vmatpush1.bf16.msra.mxu1 %v1832_v33  ;;  %1611 = vmatprep.subr.bf16.mxu0 %v1610_v34  ;;  %v522_v33 = vld [vmem:[#allocation2 + $0xde0] sm:$0xff]  ;;  %v520_v34 = vld [vmem:[#allocation2 + $0xdd0] sm:$0xff] }
 0x115   :  { %1835 = vmatprep.subr.bf16.mxu1 %v1834_v38  ;;  %v1137_v38 = vld [vmem:[#allocation6 + $0x88] sm:$0xff]  ;;  %v1632_v41 = vpack.c.bf16 %v522_v33, %v518_v32  ;;  %v1856_v42 = vpack.c.bf16 %v524_v36, %v520_v34  ;;  %v1176_v24 = vld [vmem:[#allocation6 + $0x1c0] sm:$0xff]  ;;  %v1146_v34 = vld [vmem:[#allocation6 + $0xd0] sm:$0xff] }
 0x116   :  { %v1858_v43 = vpack.c.bf16 %v1137_v38, %v1136_v37  ;;  %v1906_v32 = vpack.c.bf16 %v1177_v25, %v1176_v24  ;;  %v1161_v33 = vld [vmem:[#allocation6 + $0x148] sm:$0xff]  ;;  %v1178_v36 = vld [vmem:[#allocation6 + $0x1d0] sm:$0xff]  ;;  %v1179_v37 = vld [vmem:[#allocation6 + $0x1d8] sm:$0xff] }
 0x117   :  { %1613 = vmatpush1.bf16.msra.mxu0 %v1612_v45  ;;  %v1121_v45 = vld [vmem:[#allocation6 + $0x8] sm:$0xff] }
 0x118   :  { %1837 = vmatpush1.bf16.msra.mxu1 %v1836_v46  ;;  %1615 = vmatprep.subr.bf16.mxu0 %v1614_v47  ;;  %v1152_v46 = vld [vmem:[#allocation6 + $0x100] sm:$0xff]  ;;  %v1890_v47 = vpack.c.bf16 %v1169_v40, %v1168_v39  ;;  %v1860_v54 = vpack.c.bf16 %v1121_v45, %v1120_v44  ;;  %v1910_v44 = vpack.c.bf16 %v1179_v37, %v1178_v36  ;;  %v1163_v45 = vld [vmem:[#allocation6 + $0x158] sm:$0xff] }
 0x119   :  { %1839 = vmatprep.subr.bf16.mxu1 %v1838_v51  ;;  %v1170_v51 = vld [vmem:[#allocation6 + $0x190] sm:$0xff]  ;;  %v1892_v55 = vpack.c.bf16 %v1153_v48, %v1152_v46  ;;  %v1148_v46 = vld [vmem:[#allocation6 + $0xe0] sm:$0xff] }
 0x11a   :  { %v1894_v60 = vpack.c.bf16 %v1171_v52, %v1170_v51  ;;  %v1180_v48 = vld [vmem:[#allocation6 + $0x1e0] sm:$0xff] }
 0x11b   :  { %1617 = vmatpush1.bf16.msra.mxu0 %v1616_v57  ;;  %v1122_v57 = vld [vmem:[#allocation6 + $0x10] sm:$0xff] }
 0x11c   :  { %1841 = vmatpush1.bf16.msra.mxu1 %v1840_v58  ;;  %1619 = vmatprep.subr.bf16.mxu0 %v1618_v59  ;;  %v1123_v58 = vld [vmem:[#allocation6 + $0x18] sm:$0xff]  ;;  %v1154_v59 = vld [vmem:[#allocation6 + $0x110] sm:$0xff] }
 0x11d   :  { %1843 = vmatprep.subr.bf16.mxu1 %v1842_v63  ;;  %v1141_v63 = vld [vmem:[#allocation6 + $0xa8] sm:$0xff]  ;;  %v1864_v2 = vpack.c.bf16 %v1123_v58, %v1122_v57  ;;  %v1896_v3 = vpack.c.bf16 %v1155_v61, %v1154_v59  ;;  %v1151_v61 = vld [vmem:[#allocation6 + $0xf8] sm:$0xff] }
 0x11e   :  { %v1866_v4 = vpack.c.bf16 %v1141_v63, %v1140_v62  ;;  %v1165_v58 = vld [vmem:[#allocation6 + $0x168] sm:$0xff]  ;;  %v1182_v62 = vld [vmem:[#allocation6 + $0x1f0] sm:$0xff] }
 0x11f   :  { %1621 = vmatpush1.bf16.msra.mxu0 %v1620_v5  ;;  %v1124_v5 = vld [vmem:[#allocation6 + $0x20] sm:$0xff] }
 0x120   :  { %1845 = vmatpush1.bf16.msra.mxu1 %v1844_v6  ;;  %1623 = vmatprep.subr.bf16.mxu0 %v1622_v7  ;;  %v1125_v6 = vld [vmem:[#allocation6 + $0x28] sm:$0xff]  ;;  %v1156_v7 = vld [vmem:[#allocation6 + $0x120] sm:$0xff] }
 0x121   :  { %1847 = vmatprep.subr.bf16.mxu1 %v1846_v11  ;;  %v1143_v11 = vld [vmem:[#allocation6 + $0xb8] sm:$0xff]  ;;  %v1868_v14 = vpack.c.bf16 %v1125_v6, %v1124_v5  ;;  %v1900_v15 = vpack.c.bf16 %v1157_v9, %v1156_v7  ;;  %v1166_v5 = vld [vmem:[#allocation6 + $0x170] sm:$0xff] }
 0x122   :  { %v1870_v16 = vpack.c.bf16 %v1143_v11, %v1142_v10  ;;  %v1167_v6 = vld [vmem:[#allocation6 + $0x178] sm:$0xff] }
 0x123   :  { %1625 = vmatpush1.bf16.msra.mxu0 %v1624_v17  ;;  %v1126_v17 = vld [vmem:[#allocation6 + $0x30] sm:$0xff]  ;;  %v1920_v7 = vpack.c.bf16 %v1167_v6, %v1166_v5  ;;  %v526_v11 = vld [vmem:[#allocation4] sm:$0xf] }
 0x124   :  { %1849 = vmatpush1.bf16.msra.mxu1 %v1848_v18  ;;  %1627 = vmatprep.subr.bf16.mxu0 %v1626_v19  ;;  %v1127_v18 = vld [vmem:[#allocation6 + $0x38] sm:$0xff]  ;;  %v1158_v19 = vld [vmem:[#allocation6 + $0x130] sm:$0xff] }
 0x125   :  { %1851 = vmatprep.subr.bf16.mxu1 %v1850_v23  ;;  %v1145_v23 = vld [vmem:[#allocation6 + $0xc8] sm:$0xff]  ;;  %v1872_v26 = vpack.c.bf16 %v1127_v18, %v1126_v17  ;;  %v1904_v27 = vpack.c.bf16 %v1159_v21, %v1158_v19 }
 0x126   :  { %v1874_v28 = vpack.c.bf16 %v1145_v23, %v1144_v22 }
 0x127   :  { %1629 = vmatpush1.bf16.msra.mxu0 %v1628_v29  ;;  %v1128_v29 = vld [vmem:[#allocation6 + $0x40] sm:$0xff] }
 0x128   :  { %1853 = vmatpush1.bf16.msra.mxu1 %v1852_v30  ;;  %1631 = vmatprep.subr.bf16.mxu0 %v1630_v31  ;;  %v1129_v30 = vld [vmem:[#allocation6 + $0x48] sm:$0xff]  ;;  %v1160_v31 = vld [vmem:[#allocation6 + $0x140] sm:$0xff] }
 0x129   :  { %1855 = vmatprep.subr.bf16.mxu1 %v1854_v35  ;;  %v1147_v35 = vld [vmem:[#allocation6 + $0xd8] sm:$0xff]  ;;  %v1876_v38 = vpack.c.bf16 %v1129_v30, %v1128_v29  ;;  %v1908_v39 = vpack.c.bf16 %v1161_v33, %v1160_v31  ;;  %v1339_v33 = vld [vmem:[#allocation7] ss:$0 sm:$0xff] }
 0x12a   :  { %v1878_v40 = vpack.c.bf16 %v1147_v35, %v1146_v34 }
 0x12b   :  { %1633 = vmatpush1.bf16.msra.mxu0 %v1632_v41  ;;  %v1130_v41 = vld [vmem:[#allocation6 + $0x50] sm:$0xff] }
 0x12c   :  { %1857 = vmatpush1.bf16.msra.mxu1 %v1856_v42  ;;  %1859 = vmatprep.subr.bf16.mxu0 %v1858_v43  ;;  %v1131_v42 = vld [vmem:[#allocation6 + $0x58] sm:$0xff]  ;;  %v1162_v43 = vld [vmem:[#allocation6 + $0x150] sm:$0xff] }
 0x12d   :  { %1891 = vmatprep.subr.bf16.mxu1 %v1890_v47  ;;  %v1149_v47 = vld [vmem:[#allocation6 + $0xe8] sm:$0xff]  ;;  %v1880_v50 = vpack.c.bf16 %v1131_v42, %v1130_v41  ;;  %v1912_v51 = vpack.c.bf16 %v1163_v45, %v1162_v43 }
 0x12e   :  { %826 = vmatmul.mubr.f32.vlgmr.msra.gmra.mrb[0].mxu0 %v77_v53  ;;  %v1882_v52 = vpack.c.bf16 %v1149_v47, %v1148_v46 }
 0x12f   :  { %1110 = vmatmul.mubr.f32.vlgmr.msra.gmra.mrb[0].mxu1 %v77_v53  ;;  %1861 = vmatpush3.bf16.msra.mxu0 %v1860_v54  ;;  %v1914_v53 = vpack.c.bf16 %v1181_v49, %v1180_v48  ;;  %v1132_v54 = vld [vmem:[#allocation6 + $0x60] sm:$0xff] }
 0x130   :  { %1893 = vmatpush3.bf16.msra.mxu1 %v1892_v55  ;;  %1863 = vmatprep.subr.bf16.mxu0 %v1862_v56  ;;  %v1133_v55 = vld [vmem:[#allocation6 + $0x68] sm:$0xff]  ;;  %v1164_v56 = vld [vmem:[#allocation6 + $0x160] sm:$0xff] }
 0x131   :  { %1895 = vmatprep.subr.bf16.mxu1 %v1894_v60  ;;  %v1884_v57 = vpack.c.bf16 %v1133_v55, %v1132_v54  ;;  %v1916_v59 = vpack.c.bf16 %v1165_v58, %v1164_v56  ;;  %v1150_v60 = vld [vmem:[#allocation6 + $0xf0] sm:$0xff] }
 0x132   :  { %v1886_v63 = vpack.c.bf16 %v1151_v61, %v1150_v60 }
 0x133   :  { %1865 = vmatpush3.bf16.msra.mxu0 %v1864_v2  ;;  %v1135_v2 = vld [vmem:[#allocation6 + $0x78] sm:$0xff] }
 0x134   :  { %1897 = vmatpush3.bf16.msra.mxu1 %v1896_v3  ;;  %1867 = vmatprep.subr.bf16.mxu0 %v1866_v4  ;;  %v1918_v3 = vpack.c.bf16 %v1183_v0, %v1182_v62  ;;  %v1888_v4 = vpack.c.bf16 %v1135_v2, %v1134_v1 }
 0x135   :  { %1899 = vmatprep.subr.bf16.mxu1 %v1898_v8  ;;  %v528_v8 = vlaneseq }
 0x137   :  { %1869 = vmatpush3.bf16.msra.mxu0 %v1868_v14  ;;  %v529_v9 = vshrl.u32 %v528_v8, 7 }
 0x138   :  { %1901 = vmatpush3.bf16.msra.mxu1 %v1900_v15  ;;  %1871 = vmatprep.subr.bf16.mxu0 %v1870_v16 }
 0x139   :  { %1903 = vmatprep.subr.bf16.mxu1 %v1902_v20  ;;  %v530_v10 = vsub.s32 0, %v529_v9  ;;  %v538_v12 = vsub.s32 2, %v529_v9  ;;  %v534_v13 = vsub.s32 1, %v529_v9  ;;  %v542_v14 = vsub.s32 3, %v529_v9 }
 0x13b   :  { %1873 = vmatpush3.bf16.msra.mxu0 %v1872_v26  ;;  %v531_v15 = vrot.slane %v526_v11, %v530_v10  ;;  %v539_v16 = vrot.slane %v526_v11, %v538_v12  ;;  %v535_v17 = vrot.slane %v526_v11, %v534_v13  ;;  %v543_v18 = vrot.slane %v526_v11, %v542_v14 }
 0x13c   :  { %1905 = vmatpush3.bf16.msra.mxu1 %v1904_v27  ;;  %1875 = vmatprep.subr.bf16.mxu0 %v1874_v28 }
 0x13d   :  { %1907 = vmatprep.subr.bf16.mxu1 %v1906_v32 }
 0x13f   :  { %1877 = vmatpush3.bf16.msra.mxu0 %v1876_v38 }
 0x140   :  { %1909 = vmatpush3.bf16.msra.mxu1 %v1908_v39  ;;  %1879 = vmatprep.subr.bf16.mxu0 %v1878_v40 }
 0x141   :  { %1911 = vmatprep.subr.bf16.mxu1 %v1910_v44 }
 0x143   :  { %1881 = vmatpush3.bf16.msra.mxu0 %v1880_v50 }
 0x144   :  { %1913 = vmatpush3.bf16.msra.mxu1 %v1912_v51  ;;  %1883 = vmatprep.subr.bf16.mxu0 %v1882_v52 }
 0x145   :  { %1915 = vmatprep.subr.bf16.mxu1 %v1914_v53 }
 0x147   :  { %1885 = vmatpush3.bf16.msra.mxu0 %v1884_v57 }
 0x148   :  { %1917 = vmatpush3.bf16.msra.mxu1 %v1916_v59  ;;  %1887 = vmatprep.subr.bf16.mxu0 %v1886_v63 }
 0x149   :  { %1919 = vmatprep.subr.bf16.mxu1 %v1918_v3 }
 0x14b   :  { %1889 = vmatpush3.bf16.msra.mxu0 %v1888_v4 }
 0x14c   :  { %1921 = vmatpush3.bf16.msra.mxu1 %v1920_v7 }
 0x201   :  { %v827_v19 = vpop.f32.mrb[0].mxu0 }
 0x202   :  { %v1922_v20 = vadd.f32 %v827_v19, %v531_v15  ;;  %v1111_v21 = vpop.f32.mrb[0].mxu1  ;;  %v829_v22 = vpop.f32.mrb[1].mxu0 }
 0x203   :  { %v1924_v23 = vadd.f32 %v1111_v21, %v539_v16  ;;  %v1923_v24 = vadd.f32 %v829_v22, %v535_v17  ;;  %v1113_v25 = vpop.f32.mrb[1].mxu1 }
 0x204   :  { %v1925_v26 = vadd.f32 %v1113_v25, %v543_v18  ;;  %v1116_v28 = vmax.f32 %v1922_v20, 0.0 }
 0x205   :  { %v1117_v27 = vmax.f32 %v1923_v24, 0.0  ;;  %v1118_v30 = vmax.f32 %v1924_v23, 0.0 }
 0x206   :  { %v1119_v29 = vmax.f32 %v1925_v26, 0.0 }
 0x207   :  { %1255 = vmatprep.mubr.f32.mxu0 %v1117_v27 }
 0x208   :  { %1325 = vmatprep.mubr.f32.mxu1 %v1119_v29  ;;  %1256 = vmatmul.mubr.f32.vlgmr.msra.gmra.mrb[2].mxu0 %v1116_v28 }
 0x209   :  { %1326 = vmatmul.mubr.f32.vlgmr.msra.gmra.mrb[2].mxu1 %v1118_v30 }
 0x2db   :  { %v1372_v31 = vpop.f32.mrb[2].mxu0 }
 0x2dc   :  { %v1407_v32 = vpop.f32.mrb[2].mxu1  ;;  %v1373_v34 = vpop.f32.mrb[3].mxu0 }
 0x2dd   :  { %v1374_v35 = vadd.f32 %v1373_v34, %v1372_v31  ;;  %v1408_v36 = vpop.f32.mrb[3].mxu1 }
 0x2de   :  { %v1409_v37 = vadd.f32 %v1408_v36, %v1407_v32 }
 0x2df   :  { %v1258_v38 = vadd.f32 %v1374_v35, %v1339_v33 }
 0x2e1   :  { %v1328_v39 = vadd.f32 %v1409_v37, %v1258_v38 }
 0x2e3   :  { %1331 = vst [vmem:[%s2164_s5] sm:$0xff] %v1328_v39 }
 0x2e4   :  { %1336 = vsyncpa [#allocation3], 1 }
 0x2e5   :  { %1337 = vsyncpa [#allocation5], 1 }
 0x2e6   :  { %1338 = vsyncpa [#allocation8], 1 }

</bundles_post_ra>
